<compile_context>
chip_gen: v5e
topology: v5e:2x2
jax: 0.10.0
libtpu: 0.0.40
codegen_flags: <defaults>
</compile_context>

<pallas_src>
import jax
import jax.numpy as jnp
from jax.experimental import pallas as pl
from jax.experimental.pallas import tpu as pltpu

N_LAYERS = 3
LANE = 128
SUBLANE = 8


def _round_up(x, m):
    return (x + m - 1) // m * m


def quality_model_kernel(x_ref, e_ref, src_ref, dstrow_ref, batch_ref,
                         invdeg_ref, invcnt_ref,
                         wn_ref, w1x_ref, w1e_ref, w1b2_ref, wout_ref,
                         out_ref, h_scr, hx_scr, acc_scr):
    f32, bf16 = jnp.float32, jnp.bfloat16
    layer = pl.program_id(0)
    et = pl.program_id(1)
    n_layers = pl.num_programs(0)
    n_et = pl.num_programs(1)
    n_pad = h_scr.shape[0]
    te = src_ref.shape[0]

    # ---- one-time init: node encoder ----
    @pl.when((layer == 0) & (et == 0))
    def _init():
        h_scr[...] = jnp.dot(x_ref[...], wn_ref[...], preferred_element_type=f32)

    # ---- per-layer init: zero accumulator, hoist h @ W1x out of the edge loop ----
    @pl.when(et == 0)
    def _layer_init():
        acc_scr[...] = jnp.zeros_like(acc_scr)
        # Reassociated gather: (OH @ h) @ W1x == OH @ (h @ W1x); once per layer.
        hx_scr[...] = jnp.dot(h_scr[...].astype(bf16), w1x_ref[0],
                              preferred_element_type=f32).astype(bf16)

    # ---- messages for this edge tile ----
    # gather x_j @ W1x = OH_src @ hx : exact 0/1 one-hot built directly in bf16
    gather_oh = (jax.lax.broadcasted_iota(jnp.int32, (te, n_pad), 1)
                 == src_ref[...]).astype(bf16)                          # (TE, N)
    pre = (jnp.dot(gather_oh, hx_scr[...], preferred_element_type=f32)
           + jnp.dot(e_ref[...], w1e_ref[0], preferred_element_type=f32))
    msg = jnp.maximum(pre, 0.0)                                         # (TE, H) f32

    # scatter-add to destination nodes: acc[n] += sum_e 1[dst[e]==n] * msg[e]
    dst_row = dstrow_ref[0]                                             # (1, TE)
    scatter_oh = (jax.lax.broadcasted_iota(jnp.int32, (n_pad, te), 0)
                  == dst_row).astype(bf16)                              # (N, TE)
    acc_scr[...] += jnp.dot(scatter_oh, msg.astype(bf16),
                            preferred_element_type=f32)

    # ---- layer finalize: mean normalize (f32), fused (W1b@W2), residual ----
    @pl.when(et == n_et - 1)
    def _finish_layer():
        agg = acc_scr[...] * invdeg_ref[...]                            # f32 VPU
        h_scr[...] += jnp.dot(agg.astype(bf16), w1b2_ref[0],
                              preferred_element_type=f32)

    # ---- final step: global mean pool + output head ----
    @pl.when((layer == n_layers - 1) & (et == n_et - 1))
    def _finish_model():
        b_pad = out_ref.shape[0]
        pool_oh = (jax.lax.broadcasted_iota(jnp.int32, (b_pad, n_pad), 0)
                   == batch_ref[...]).astype(bf16)                      # (B, N)
        pooled = (jnp.dot(pool_oh, h_scr[...].astype(bf16),
                          preferred_element_type=f32) * invcnt_ref[...])
        out_ref[...] = jnp.dot(pooled.astype(bf16), wout_ref[...],
                               preferred_element_type=f32)


def quality_model_forward(x, edge_features, edge_index, batch, params, num_graphs,
                          *, edge_tile=256):
    """Pad to TPU-friendly shapes, precompute small normalizers + edge encoding,
    run the kernel."""
    N, C = x.shape
    E = edge_features.shape[0]
    H = params["w_node"].shape[1]
    O = params["w_out"].shape[1]

    f32, bf16 = jnp.float32, jnp.bfloat16
    # No point in a tile larger than the edge count; keep it sublane-aligned.
    edge_tile = _round_up(min(max(edge_tile, SUBLANE), max(E, SUBLANE)), SUBLANE)
    n_pad = _round_up(N, LANE)            # lane-dense gather one-hot / K-aligned MXU
    e_pad = _round_up(E, edge_tile)
    b_pad = _round_up(num_graphs, SUBLANE)
    h_pad = _round_up(H, LANE)
    o_pad = _round_up(O, LANE)
    n_et = e_pad // edge_tile

    src, dst = edge_index[0].astype(jnp.int32), edge_index[1].astype(jnp.int32)

    # --- padded inputs; padded edges/nodes get out-of-range indices -> dropped
    x_p = jnp.zeros((n_pad, C), bf16).at[:N].set(x.astype(bf16))
    # layer-invariant edge encoding computed once (f32), streamed as bf16 lane-dense tiles
    e_enc = (edge_features.astype(f32) @ params["w_edge"]).astype(bf16)
    e_p = jnp.zeros((e_pad, h_pad), bf16).at[:E, :H].set(e_enc)
    src_p = jnp.zeros((e_pad, 1), jnp.int32).at[:E, 0].set(src)
    dst_rows = (jnp.full((e_pad,), n_pad, jnp.int32).at[:E].set(dst)
                .reshape(n_et, 1, edge_tile))
    batch_p = jnp.full((1, n_pad), b_pad, jnp.int32).at[0, :N].set(batch.astype(jnp.int32))

    # --- mean normalizers via cheap segment adds (no dense one-hots)
    deg = jnp.zeros((n_pad,), f32).at[dst].add(1.0)
    inv_deg = (1.0 / jnp.maximum(deg, 1.0)).reshape(n_pad, 1)
    cnt = jnp.zeros((b_pad,), f32).at[batch].add(1.0)
    inv_cnt = (1.0 / jnp.maximum(cnt, 1.0)).reshape(b_pad, 1)

    # --- weights: fuse w1b@w2 in f32, zero-pad feature dims to lane width, bf16
    def pad2(w, r, c):
        return jnp.zeros((r, c), f32).at[:w.shape[0], :w.shape[1]].set(w)

    w1b2 = jnp.einsum("lij,ljk->lik", params["w1b"], params["w2"])
    wn_p = pad2(params["w_node"], C, h_pad).astype(bf16)
    w1x_p = jnp.zeros((N_LAYERS, h_pad, h_pad), f32).at[:, :H, :H].set(params["w1x"]).astype(bf16)
    w1e_p = jnp.zeros((N_LAYERS, h_pad, h_pad), f32).at[:, :H, :H].set(params["w1e"]).astype(bf16)
    w1b2_p = jnp.zeros((N_LAYERS, h_pad, h_pad), f32).at[:, :H, :H].set(w1b2).astype(bf16)
    wout_p = pad2(params["w_out"], h_pad, o_pad).astype(bf16)

    def _fixed(shape):
        nd = len(shape)
        return pl.BlockSpec(shape, lambda l, et, _nd=nd: (0,) * _nd)

    in_specs = [
        _fixed((n_pad, C)),                                         # x (bf16)
        pl.BlockSpec((edge_tile, h_pad), lambda l, et: (et, 0)),    # e = ef@W_edge (bf16)
        pl.BlockSpec((edge_tile, 1), lambda l, et: (et, 0)),        # src (column)
        pl.BlockSpec((1, 1, edge_tile), lambda l, et: (et, 0, 0)),  # dst (row)
        _fixed((1, n_pad)),                                         # batch (row)
        _fixed((n_pad, 1)),                                         # 1/deg
        _fixed((b_pad, 1)),                                         # 1/|graph|
        _fixed((C, h_pad)),                                         # w_node
        pl.BlockSpec((1, h_pad, h_pad), lambda l, et: (l, 0, 0)),   # w1x[l]
        pl.BlockSpec((1, h_pad, h_pad), lambda l, et: (l, 0, 0)),   # w1e[l]
        pl.BlockSpec((1, h_pad, h_pad), lambda l, et: (l, 0, 0)),   # (w1b@w2)[l]
        _fixed((h_pad, o_pad)),                                     # w_out
    ]

    # --- rough cost estimate for the XLA scheduler
    flops = (2 * n_pad * C * h_pad
             + N_LAYERS * (2 * n_pad * h_pad * h_pad            # hx = h @ W1x
                           + 2 * e_pad * n_pad * h_pad * 2      # gather + scatter
                           + 2 * e_pad * h_pad * h_pad          # e @ W1e
                           + 2 * n_pad * h_pad * h_pad)         # fused w1b@w2
             + 2 * b_pad * n_pad * h_pad + 2 * b_pad * h_pad * o_pad)
    operands = (x_p, e_p, src_p, dst_rows, batch_p, inv_deg, inv_cnt,
                wn_p, w1x_p, w1e_p, w1b2_p, wout_p)
    bytes_accessed = (sum(int(a.size) * a.dtype.itemsize for a in operands)
                      + b_pad * o_pad * 4)

    # --- VMEM budget: resident scratch + double-buffered streams + one-hot
    #     transients; cap at 56 MiB so the same config fits v7x (64 MiB VMEM).
    vmem_est = (2 * n_pad * h_pad * 4 + n_pad * h_pad * 2          # h, acc, hx
                + 2 * (edge_tile * h_pad * 2 + 2 * edge_tile * 4   # e/src/dst tiles
                       + 3 * h_pad * h_pad * 2)                    # per-layer weights
                + 2 * edge_tile * n_pad * 2                        # one-hot transients
                + n_pad * C * 2 + C * h_pad * 2
                + h_pad * o_pad * 2 + b_pad * o_pad * 4
                + (2 * n_pad + b_pad) * 4)
    vmem_limit = int(min(56 * 1024 * 1024, max(32 * 1024 * 1024, 2 * vmem_est)))

    out_padded = pl.pallas_call(
        quality_model_kernel,
        out_shape=jax.ShapeDtypeStruct((b_pad, o_pad), f32),
        grid_spec=pltpu.PrefetchScalarGridSpec(
            num_scalar_prefetch=0,
            grid=(N_LAYERS, n_et),
            in_specs=in_specs,
            out_specs=pl.BlockSpec((b_pad, o_pad), lambda l, et: (0, 0)),
            scratch_shapes=[pltpu.VMEM((n_pad, h_pad), f32),    # node state h
                            pltpu.VMEM((n_pad, h_pad), bf16),   # hx = h @ W1x[l]
                            pltpu.VMEM((n_pad, h_pad), f32)],   # scatter accumulator
        ),
        compiler_params=pltpu.CompilerParams(
            # both axes are sequential: layers chain, edge tiles reduce into acc
            dimension_semantics=("arbitrary", "arbitrary"),
            vmem_limit_bytes=vmem_limit,
        ),
        cost_estimate=pl.CostEstimate(flops=flops, transcendentals=0,
                                      bytes_accessed=bytes_accessed),
    )(*operands)

    return out_padded[:num_graphs, :O]


def quality_model_reference(x, edge_features, edge_index, batch, params, num_graphs):
    """Pure-JAX f32 reference mirroring the PyTorch forward."""
    src, dst = edge_index[0], edge_index[1]
    h = x @ params["w_node"]
    e = edge_features @ params["w_edge"]
    N = x.shape[0]
    for l in range(N_LAYERS):
        xj = h[src]
        m = jnp.maximum(xj @ params["w1x"][l] + e @ params["w1e"][l], 0.0)
        m = m @ params["w1b"][l]
        summed = jnp.zeros((N, h.shape[1]), jnp.float32).at[dst].add(m)
        deg = jnp.maximum(jnp.zeros((N,), jnp.float32).at[dst].add(1.0), 1.0)
        agg = summed / deg[:, None]
        h = h + agg @ params["w2"][l]
    summed = jnp.zeros((num_graphs, h.shape[1]), jnp.float32).at[batch].add(h)
    cnt = jnp.maximum(jnp.zeros((num_graphs,), jnp.float32).at[batch].add(1.0), 1.0)
    pooled = summed / cnt[:, None]
    return pooled @ params["w_out"]


if __name__ == "__main__":
    key = jax.random.PRNGKey(0)
    N, E, C, H, O, B = 16, 32, 8, 32, 4, 2   # nodes, edges, in_ch, hidden, out_ch, graphs

    keys = jax.random.split(key, 11)
    x = jax.random.normal(keys[0], (N, C), jnp.float32)
    edge_features = jax.random.normal(keys[1], (E, C), jnp.float32)
    src = jax.random.randint(keys[2], (E,), 0, N, dtype=jnp.int32)
    dst = jax.random.randint(keys[3], (E,), 0, N, dtype=jnp.int32)
    edge_index = jnp.stack([src, dst])
    batch = jnp.concatenate([jnp.zeros(N // 2, jnp.int32),
                             jnp.ones(N - N // 2, jnp.int32)])

    scale = jnp.float32(0.1)
    params = {
        "w_node": scale * jax.random.normal(keys[4], (C, H), jnp.float32),
        "w_edge": scale * jax.random.normal(keys[5], (C, H), jnp.float32),
        "w1x":   scale * jax.random.normal(keys[6], (N_LAYERS, H, H), jnp.float32),
        "w1e":   scale * jax.random.normal(keys[7], (N_LAYERS, H, H), jnp.float32),
        "w1b":   scale * jax.random.normal(keys[8], (N_LAYERS, H, H), jnp.float32),
        "w2":    scale * jax.random.normal(keys[9], (N_LAYERS, H, H), jnp.float32),
        "w_out": scale * jax.random.normal(keys[10], (H, O), jnp.float32),
    }

    out = quality_model_forward(x, edge_features, edge_index, batch, params, num_graphs=B)
    jax.block_until_ready(out)

    ref = quality_model_reference(x, edge_features, edge_index, batch, params, num_graphs=B)
    assert out.shape == (B, O)
    err = float(jnp.max(jnp.abs(out - ref)))
    # bf16 MXU operands (f32 accumulation) + fused w1b@w2 -> small rounding vs f32 ref
    assert jnp.allclose(out, ref, atol=2e-2, rtol=2e-2), (err, out, ref)

    print("KERNEL_OK")
</pallas_src>

<mosaic_0001>
module attributes {stable_mosaic.version = 11 : i64} {
  func.func @quality_model_kernel(%arg0: i32, %arg1: i32, %arg2: memref<128x8xbf16, #tpu.memory_space<vmem>>, %arg3: memref<32x128xbf16, #tpu.memory_space<vmem>>, %arg4: memref<32x1xi32, #tpu.memory_space<vmem>>, %arg5: memref<1x1x32xi32, #tpu.memory_space<vmem>>, %arg6: memref<1x128xi32, #tpu.memory_space<vmem>>, %arg7: memref<128x1xf32, #tpu.memory_space<vmem>>, %arg8: memref<8x1xf32, #tpu.memory_space<vmem>>, %arg9: memref<8x128xbf16, #tpu.memory_space<vmem>>, %arg10: memref<1x128x128xbf16, #tpu.memory_space<vmem>>, %arg11: memref<1x128x128xbf16, #tpu.memory_space<vmem>>, %arg12: memref<1x128x128xbf16, #tpu.memory_space<vmem>>, %arg13: memref<128x128xbf16, #tpu.memory_space<vmem>>, %arg14: memref<8x128xf32, #tpu.memory_space<vmem>>, %arg15: memref<128x128xf32, #tpu.memory_space<vmem>>, %arg16: memref<128x128xbf16, #tpu.memory_space<vmem>>, %arg17: memref<128x128xf32, #tpu.memory_space<vmem>>) attributes {dimension_semantics = [#tpu.dimension_semantics<arbitrary>, #tpu.dimension_semantics<arbitrary>], iteration_bounds = array<i64: 3, 1>, scalar_prefetch = 0 : i64, scratch_operands = 3 : i64, tpu.core_type = #tpu.core_type<tc>, window_params = [{pipeline_mode = #tpu.pipeline_mode<synchronous>, transform_indices = @transform_0, window_bounds = array<i64: 128, 8>}, {transform_indices = @transform_1, window_bounds = array<i64: 32, 128>}, {transform_indices = @transform_2, window_bounds = array<i64: 32, 1>}, {transform_indices = @transform_3, window_bounds = array<i64: 1, 1, 32>}, {pipeline_mode = #tpu.pipeline_mode<synchronous>, transform_indices = @transform_4, window_bounds = array<i64: 1, 128>}, {pipeline_mode = #tpu.pipeline_mode<synchronous>, transform_indices = @transform_5, window_bounds = array<i64: 128, 1>}, {pipeline_mode = #tpu.pipeline_mode<synchronous>, transform_indices = @transform_6, window_bounds = array<i64: 8, 1>}, {pipeline_mode = #tpu.pipeline_mode<synchronous>, transform_indices = @transform_7, window_bounds = array<i64: 8, 128>}, {transform_indices = @transform_8, window_bounds = array<i64: 1, 128, 128>}, {transform_indices = @transform_9, window_bounds = array<i64: 1, 128, 128>}, {transform_indices = @transform_10, window_bounds = array<i64: 1, 128, 128>}, {pipeline_mode = #tpu.pipeline_mode<synchronous>, transform_indices = @transform_11, window_bounds = array<i64: 128, 128>}, {pipeline_mode = #tpu.pipeline_mode<synchronous>, transform_indices = @transform_12, window_bounds = array<i64: 8, 128>}]} {
    %c0_i32 = arith.constant 0 : i32
    %0 = arith.cmpi eq, %arg0, %c0_i32 : i32
    %c0_i32_0 = arith.constant 0 : i32
    %1 = arith.cmpi eq, %arg1, %c0_i32_0 : i32
    %2 = arith.andi %0, %1 : i1
    %3 = arith.extui %2 : i1 to i32
    %c0_i32_1 = arith.constant 0 : i32
    %4 = arith.cmpi ne, %3, %c0_i32_1 : i32
    scf.if %4 {
      %c0_26 = arith.constant 0 : index
      %c0_27 = arith.constant 0 : index
      %45 = vector.load %arg2[%c0_26, %c0_27] : memref<128x8xbf16, #tpu.memory_space<vmem>>, vector<128x8xbf16>
      %c0_28 = arith.constant 0 : index
      %c0_29 = arith.constant 0 : index
      %46 = vector.load %arg9[%c0_28, %c0_29] : memref<8x128xbf16, #tpu.memory_space<vmem>>, vector<8x128xbf16>
      %cst_30 = arith.constant dense<0.000000e+00> : vector<128x128xf32>
      %47 = tpu.matmul %45, %46, %cst_30 {dimension_numbers = #tpu.dot_dimension_numbers<[1], [0], [0], [1], [0, 0, 1, 1], [], []>} : vector<128x8xbf16>, vector<8x128xbf16>, vector<128x128xf32> -> vector<128x128xf32>
      %c0_31 = arith.constant 0 : index
      %c0_32 = arith.constant 0 : index
      %48 = vector.load %arg15[%c0_31, %c0_32] : memref<128x128xf32, #tpu.memory_space<vmem>>, vector<128x128xf32>
      tpu.vector_store %arg15[%c0_31, %c0_32], %47 {strides = array<i32>} : memref<128x128xf32, #tpu.memory_space<vmem>>, vector<128x128xf32>,
    } else {
    }
    %c0_i32_2 = arith.constant 0 : i32
    %5 = arith.cmpi eq, %arg1, %c0_i32_2 : i32
    %6 = arith.extui %5 : i1 to i32
    %c0_i32_3 = arith.constant 0 : i32
    %7 = arith.cmpi ne, %6, %c0_i32_3 : i32
    scf.if %7 {
      %cst_26 = arith.constant 0.000000e+00 : f32
      %45 = vector.broadcast %cst_26 : f32 to vector<128x128xf32>
      %c0_27 = arith.constant 0 : index
      %c0_28 = arith.constant 0 : index
      %46 = vector.load %arg17[%c0_27, %c0_28] : memref<128x128xf32, #tpu.memory_space<vmem>>, vector<128x128xf32>
      tpu.vector_store %arg17[%c0_27, %c0_28], %45 {strides = array<i32>} : memref<128x128xf32, #tpu.memory_space<vmem>>, vector<128x128xf32>,
      %c0_29 = arith.constant 0 : index
      %c0_30 = arith.constant 0 : index
      %47 = vector.load %arg15[%c0_29, %c0_30] : memref<128x128xf32, #tpu.memory_space<vmem>>, vector<128x128xf32>
      %48 = arith.truncf %47 : vector<128x128xf32> to vector<128x128xbf16>
      %c0_31 = arith.constant 0 : index
      %c0_32 = arith.constant 0 : index
      %c0_33 = arith.constant 0 : index
      %49 = vector.load %arg10[%c0_31, %c0_32, %c0_33] : memref<1x128x128xbf16, #tpu.memory_space<vmem>>, vector<1x128x128xbf16>
      %50 = vector.shape_cast %49 : vector<1x128x128xbf16> to vector<128x128xbf16>
      %cst_34 = arith.constant dense<0.000000e+00> : vector<128x128xf32>
      %51 = tpu.matmul %48, %50, %cst_34 {dimension_numbers = #tpu.dot_dimension_numbers<[1], [0], [0], [1], [0, 0, 1, 1], [], []>} : vector<128x128xbf16>, vector<128x128xbf16>, vector<128x128xf32> -> vector<128x128xf32>
      %52 = arith.truncf %51 : vector<128x128xf32> to vector<128x128xbf16>
      %c0_35 = arith.constant 0 : index
      %c0_36 = arith.constant 0 : index
      %53 = vector.load %arg16[%c0_35, %c0_36] : memref<128x128xbf16, #tpu.memory_space<vmem>>, vector<128x128xbf16>
      tpu.vector_store %arg16[%c0_35, %c0_36], %52 {strides = array<i32>} : memref<128x128xbf16, #tpu.memory_space<vmem>>, vector<128x128xbf16>,
    } else {
    }
    %8 = tpu.iota {dimensions = array<i32: 1>} : vector<32x128xi32>
    %c0 = arith.constant 0 : index
    %c0_4 = arith.constant 0 : index
    %9 = vector.load %arg4[%c0, %c0_4] : memref<32x1xi32, #tpu.memory_space<vmem>>, vector<32x1xi32>
    %10 = vector.broadcast %9 : vector<32x1xi32> to vector<32x128xi32>
    %11 = arith.cmpi eq, %8, %10 : vector<32x128xi32>
    %12 = arith.extui %11 : vector<32x128xi1> to vector<32x128xi32>
    %13 = arith.sitofp %12 : vector<32x128xi32> to vector<32x128xf32>
    %14 = arith.truncf %13 : vector<32x128xf32> to vector<32x128xbf16>
    %c0_5 = arith.constant 0 : index
    %c0_6 = arith.constant 0 : index
    %15 = vector.load %arg16[%c0_5, %c0_6] : memref<128x128xbf16, #tpu.memory_space<vmem>>, vector<128x128xbf16>
    %cst = arith.constant dense<0.000000e+00> : vector<32x128xf32>
    %16 = tpu.matmul %14, %15, %cst {dimension_numbers = #tpu.dot_dimension_numbers<[1], [0], [0], [1], [0, 0, 1, 1], [], []>} : vector<32x128xbf16>, vector<128x128xbf16>, vector<32x128xf32> -> vector<32x128xf32>
    %c0_7 = arith.constant 0 : index
    %c0_8 = arith.constant 0 : index
    %17 = vector.load %arg3[%c0_7, %c0_8] : memref<32x128xbf16, #tpu.memory_space<vmem>>, vector<32x128xbf16>
    %c0_9 = arith.constant 0 : index
    %c0_10 = arith.constant 0 : index
    %c0_11 = arith.constant 0 : index
    %18 = vector.load %arg11[%c0_9, %c0_10, %c0_11] : memref<1x128x128xbf16, #tpu.memory_space<vmem>>, vector<1x128x128xbf16>
    %19 = vector.shape_cast %18 : vector<1x128x128xbf16> to vector<128x128xbf16>
    %cst_12 = arith.constant dense<0.000000e+00> : vector<32x128xf32>
    %20 = tpu.matmul %17, %19, %cst_12 {dimension_numbers = #tpu.dot_dimension_numbers<[1], [0], [0], [1], [0, 0, 1, 1], [], []>} : vector<32x128xbf16>, vector<128x128xbf16>, vector<32x128xf32> -> vector<32x128xf32>
    %21 = arith.addf %16, %20 : vector<32x128xf32>
    %cst_13 = arith.constant 0.000000e+00 : f32
    %22 = vector.broadcast %cst_13 : f32 to vector<32x128xf32>
    %23 = arith.maximumf %21, %22 : vector<32x128xf32>
    %c0_14 = arith.constant 0 : index
    %c0_15 = arith.constant 0 : index
    %c0_16 = arith.constant 0 : index
    %24 = vector.load %arg5[%c0_14, %c0_15, %c0_16] : memref<1x1x32xi32, #tpu.memory_space<vmem>>, vector<1x1x32xi32>
    %25 = vector.shape_cast %24 : vector<1x1x32xi32> to vector<1x32xi32>
    %26 = tpu.iota {dimensions = array<i32: 0>} : vector<128x32xi32>
    %27 = vector.broadcast %25 : vector<1x32xi32> to vector<128x32xi32>
    %28 = arith.cmpi eq, %26, %27 : vector<128x32xi32>
    %29 = arith.extui %28 : vector<128x32xi1> to vector<128x32xi32>
    %30 = arith.sitofp %29 : vector<128x32xi32> to vector<128x32xf32>
    %31 = arith.truncf %30 : vector<128x32xf32> to vector<128x32xbf16>
    %c0_17 = arith.constant 0 : index
    %c0_18 = arith.constant 0 : index
    %32 = vector.load %arg17[%c0_17, %c0_18] : memref<128x128xf32, #tpu.memory_space<vmem>>, vector<128x128xf32>
    %33 = arith.truncf %23 : vector<32x128xf32> to vector<32x128xbf16>
    %cst_19 = arith.constant dense<0.000000e+00> : vector<128x128xf32>
    %34 = tpu.matmul %31, %33, %cst_19 {dimension_numbers = #tpu.dot_dimension_numbers<[1], [0], [0], [1], [0, 0, 1, 1], [], []>} : vector<128x32xbf16>, vector<32x128xbf16>, vector<128x128xf32> -> vector<128x128xf32>
    %35 = arith.addf %32, %34 : vector<128x128xf32>
    %c0_20 = arith.constant 0 : index
    %c0_21 = arith.constant 0 : index
    %36 = vector.load %arg17[%c0_20, %c0_21] : memref<128x128xf32, #tpu.memory_space<vmem>>, vector<128x128xf32>
    tpu.vector_store %arg17[%c0_20, %c0_21], %35 {strides = array<i32>} : memref<128x128xf32, #tpu.memory_space<vmem>>, vector<128x128xf32>,
    %c0_i32_22 = arith.constant 0 : i32
    %37 = arith.cmpi eq, %arg1, %c0_i32_22 : i32
    %38 = arith.extui %37 : i1 to i32
    %c0_i32_23 = arith.constant 0 : i32
    %39 = arith.cmpi ne, %38, %c0_i32_23 : i32
    scf.if %39 {
      %c0_26 = arith.constant 0 : index
      %c0_27 = arith.constant 0 : index
      %45 = vector.load %arg17[%c0_26, %c0_27] : memref<128x128xf32, #tpu.memory_space<vmem>>, vector<128x128xf32>
      %c0_28 = arith.constant 0 : index
      %c0_29 = arith.constant 0 : index
      %46 = vector.load %arg7[%c0_28, %c0_29] : memref<128x1xf32, #tpu.memory_space<vmem>>, vector<128x1xf32>
      %47 = vector.broadcast %46 : vector<128x1xf32> to vector<128x128xf32>
      %48 = arith.mulf %45, %47 : vector<128x128xf32>
      %c0_30 = arith.constant 0 : index
      %c0_31 = arith.constant 0 : index
      %49 = vector.load %arg15[%c0_30, %c0_31] : memref<128x128xf32, #tpu.memory_space<vmem>>, vector<128x128xf32>
      %50 = arith.truncf %48 : vector<128x128xf32> to vector<128x128xbf16>
      %c0_32 = arith.constant 0 : index
      %c0_33 = arith.constant 0 : index
      %c0_34 = arith.constant 0 : index
      %51 = vector.load %arg12[%c0_32, %c0_33, %c0_34] : memref<1x128x128xbf16, #tpu.memory_space<vmem>>, vector<1x128x128xbf16>
      %52 = vector.shape_cast %51 : vector<1x128x128xbf16> to vector<128x128xbf16>
      %cst_35 = arith.constant dense<0.000000e+00> : vector<128x128xf32>
      %53 = tpu.matmul %50, %52, %cst_35 {dimension_numbers = #tpu.dot_dimension_numbers<[1], [0], [0], [1], [0, 0, 1, 1], [], []>} : vector<128x128xbf16>, vector<128x128xbf16>, vector<128x128xf32> -> vector<128x128xf32>
      %54 = arith.addf %49, %53 : vector<128x128xf32>
      %c0_36 = arith.constant 0 : index
      %c0_37 = arith.constant 0 : index
      %55 = vector.load %arg15[%c0_36, %c0_37] : memref<128x128xf32, #tpu.memory_space<vmem>>, vector<128x128xf32>
      tpu.vector_store %arg15[%c0_36, %c0_37], %54 {strides = array<i32>} : memref<128x128xf32, #tpu.memory_space<vmem>>, vector<128x128xf32>,
    } else {
    }
    %c2_i32 = arith.constant 2 : i32
    %40 = arith.cmpi eq, %arg0, %c2_i32 : i32
    %c0_i32_24 = arith.constant 0 : i32
    %41 = arith.cmpi eq, %arg1, %c0_i32_24 : i32
    %42 = arith.andi %40, %41 : i1
    %43 = arith.extui %42 : i1 to i32
    %c0_i32_25 = arith.constant 0 : i32
    %44 = arith.cmpi ne, %43, %c0_i32_25 : i32
    scf.if %44 {
      %45 = tpu.iota {dimensions = array<i32: 0>} : vector<8x128xi32>
      %c0_26 = arith.constant 0 : index
      %c0_27 = arith.constant 0 : index
      %46 = vector.load %arg6[%c0_26, %c0_27] : memref<1x128xi32, #tpu.memory_space<vmem>>, vector<1x128xi32>
      %47 = vector.broadcast %46 : vector<1x128xi32> to vector<8x128xi32>
      %48 = arith.cmpi eq, %45, %47 : vector<8x128xi32>
      %49 = arith.extui %48 : vector<8x128xi1> to vector<8x128xi32>
      %50 = arith.sitofp %49 : vector<8x128xi32> to vector<8x128xf32>
      %51 = arith.truncf %50 : vector<8x128xf32> to vector<8x128xbf16>
      %c0_28 = arith.constant 0 : index
      %c0_29 = arith.constant 0 : index
      %52 = vector.load %arg15[%c0_28, %c0_29] : memref<128x128xf32, #tpu.memory_space<vmem>>, vector<128x128xf32>
      %53 = arith.truncf %52 : vector<128x128xf32> to vector<128x128xbf16>
      %cst_30 = arith.constant dense<0.000000e+00> : vector<8x128xf32>
      %54 = tpu.matmul %51, %53, %cst_30 {dimension_numbers = #tpu.dot_dimension_numbers<[1], [0], [0], [1], [0, 0, 1, 1], [], []>} : vector<8x128xbf16>, vector<128x128xbf16>, vector<8x128xf32> -> vector<8x128xf32>
      %c0_31 = arith.constant 0 : index
      %c0_32 = arith.constant 0 : index
      %55 = vector.load %arg8[%c0_31, %c0_32] : memref<8x1xf32, #tpu.memory_space<vmem>>, vector<8x1xf32>
      %56 = vector.broadcast %55 : vector<8x1xf32> to vector<8x128xf32>
      %57 = arith.mulf %54, %56 : vector<8x128xf32>
      %58 = arith.truncf %57 : vector<8x128xf32> to vector<8x128xbf16>
      %c0_33 = arith.constant 0 : index
      %c0_34 = arith.constant 0 : index
      %59 = vector.load %arg13[%c0_33, %c0_34] : memref<128x128xbf16, #tpu.memory_space<vmem>>, vector<128x128xbf16>
      %cst_35 = arith.constant dense<0.000000e+00> : vector<8x128xf32>
      %60 = tpu.matmul %58, %59, %cst_35 {dimension_numbers = #tpu.dot_dimension_numbers<[1], [0], [0], [1], [0, 0, 1, 1], [], []>} : vector<8x128xbf16>, vector<128x128xbf16>, vector<8x128xf32> -> vector<8x128xf32>
      %c0_36 = arith.constant 0 : index
      %c0_37 = arith.constant 0 : index
      %61 = vector.load %arg14[%c0_36, %c0_37] : memref<8x128xf32, #tpu.memory_space<vmem>>, vector<8x128xf32>
      tpu.vector_store %arg14[%c0_36, %c0_37], %60 {strides = array<i32>} : memref<8x128xf32, #tpu.memory_space<vmem>>, vector<8x128xf32>,
    } else {
    }
    return
  }
  func.func @transform_0(%arg0: i32, %arg1: i32) -> (i32, i32) {
    %c0_i32 = arith.constant 0 : i32
    %c0_i32_0 = arith.constant 0 : i32
    %c0_i32_1 = arith.constant 0 : i32
    return %c0_i32, %c0_i32_0 : i32, i32
  }
  func.func @transform_1(%arg0: i32, %arg1: i32) -> (i32, i32) {
    %c0_i32 = arith.constant 0 : i32
    %c0_i32_0 = arith.constant 0 : i32
    return %arg1, %c0_i32 : i32, i32
  }
  func.func @transform_2(%arg0: i32, %arg1: i32) -> (i32, i32) {
    %c0_i32 = arith.constant 0 : i32
    %c0_i32_0 = arith.constant 0 : i32
    return %arg1, %c0_i32 : i32, i32
  }
  func.func @transform_3(%arg0: i32, %arg1: i32) -> (i32, i32, i32) {
    %c0_i32 = arith.constant 0 : i32
    %c0_i32_0 = arith.constant 0 : i32
    %c0_i32_1 = arith.constant 0 : i32
    return %arg1, %c0_i32, %c0_i32_0 : i32, i32, i32
  }
  func.func @transform_4(%arg0: i32, %arg1: i32) -> (i32, i32) {
    %c0_i32 = arith.constant 0 : i32
    %c0_i32_0 = arith.constant 0 : i32
    %c0_i32_1 = arith.constant 0 : i32
    return %c0_i32, %c0_i32_0 : i32, i32
  }
  func.func @transform_5(%arg0: i32, %arg1: i32) -> (i32, i32) {
    %c0_i32 = arith.constant 0 : i32
    %c0_i32_0 = arith.constant 0 : i32
    %c0_i32_1 = arith.constant 0 : i32
    return %c0_i32, %c0_i32_0 : i32, i32
  }
  func.func @transform_6(%arg0: i32, %arg1: i32) -> (i32, i32) {
    %c0_i32 = arith.constant 0 : i32
    %c0_i32_0 = arith.constant 0 : i32
    %c0_i32_1 = arith.constant 0 : i32
    return %c0_i32, %c0_i32_0 : i32, i32
  }
  func.func @transform_7(%arg0: i32, %arg1: i32) -> (i32, i32) {
    %c0_i32 = arith.constant 0 : i32
    %c0_i32_0 = arith.constant 0 : i32
    %c0_i32_1 = arith.constant 0 : i32
    return %c0_i32, %c0_i32_0 : i32, i32
  }
  func.func @transform_8(%arg0: i32, %arg1: i32) -> (i32, i32, i32) {
    %c0_i32 = arith.constant 0 : i32
    %c0_i32_0 = arith.constant 0 : i32
    %c0_i32_1 = arith.constant 0 : i32
    return %arg0, %c0_i32, %c0_i32_0 : i32, i32, i32
  }
  func.func @transform_9(%arg0: i32, %arg1: i32) -> (i32, i32, i32) {
    %c0_i32 = arith.constant 0 : i32
    %c0_i32_0 = arith.constant 0 : i32
    %c0_i32_1 = arith.constant 0 : i32
    return %arg0, %c0_i32, %c0_i32_0 : i32, i32, i32
  }
  func.func @transform_10(%arg0: i32, %arg1: i32) -> (i32, i32, i32) {
    %c0_i32 = arith.constant 0 : i32
    %c0_i32_0 = arith.constant 0 : i32
    %c0_i32_1 = arith.constant 0 : i32
    return %arg0, %c0_i32, %c0_i32_0 : i32, i32, i32
  }
  func.func @transform_11(%arg0: i32, %arg1: i32) -> (i32, i32) {
    %c0_i32 = arith.constant 0 : i32
    %c0_i32_0 = arith.constant 0 : i32
    %c0_i32_1 = arith.constant 0 : i32
    return %c0_i32, %c0_i32_0 : i32, i32
  }
  func.func @transform_12(%arg0: i32, %arg1: i32) -> (i32, i32) {
    %c0_i32 = arith.constant 0 : i32
    %c0_i32_0 = arith.constant 0 : i32
    %c0_i32_1 = arith.constant 0 : i32
    return %c0_i32, %c0_i32_0 : i32, i32
  }
}

</mosaic_0001>

<bundles_post_ra>
// kernel: tpu_custom_call.1
= control target key start
LH: loop header
LB: loop body
LE: loop exit
PB: predicated region body
PF: predicated region fallthrough
CT: control target
= control target key end

     0   :  { %s3052_s0 = inlined_call_operand.vmem [shape: bf16[128,8], index: 0, kind: input, shape index: {}]   ;;  %s3053_s1 = inlined_call_operand.vmem [shape: bf16[32,128], index: 1, kind: input, shape index: {}]   ;;  %s3054_s2 = inlined_call_operand.vmem [shape: s32[32,1], index: 2, kind: input, shape index: {}]   ;;  %s3055_s3 = inlined_call_operand.vmem [shape: s32[1,1,32], index: 3, kind: input, shape index: {}]   ;;  %s3056_s4 = inlined_call_operand.vmem [shape: s32[1,128], index: 4, kind: input, shape index: {}]   ;;  %s3057_s5 = inlined_call_operand.vmem [shape: f32[128,1], index: 5, kind: input, shape index: {}]   ;;  %s3058_s6 = inlined_call_operand.vmem [shape: f32[8,1], index: 6, kind: input, shape index: {}]   ;;  %s3059_s7 = inlined_call_operand.vmem [shape: bf16[8,128], index: 7, kind: input, shape index: {}]   ;;  %s3060_s8 = inlined_call_operand.vmem [shape: bf16[3,128,128], index: 8, kind: input, shape index: {}]   ;;  %s3061_s9 = inlined_call_operand.hbm [shape: bf16[3,128,128], index: 9, kind: input, shape index: {}]   ;;  %s3062_s10 = inlined_call_operand.hbm [shape: bf16[3,128,128], index: 10, kind: input, shape index: {}]   ;;  %s3063_s11 = inlined_call_operand.hbm [shape: bf16[128,128], index: 11, kind: input, shape index: {}]   ;;  %s3064_s12 = inlined_call_operand.hbm [shape: f32[8,128], index: 12, kind: output, shape index: {}]  }
   0x1   :  { %3073 = sst [smem:[#allocation20_spill]] %s3053_s1 }
   0x2   :  { %3074 = sst [smem:[#allocation21_spill]] %s3055_s3 }
   0x3   :  { %3075 = sst [smem:[#allocation22_spill]] %s3056_s4 }
   0x4   :  { %3076 = sst [smem:[#allocation23_spill]] %s3058_s6 }
   0x5   :  { %3077 = sst [smem:[#allocation24_spill]] %s3063_s11 }
   0x6   :  { %3078 = sst [smem:[#allocation25_spill]] %s3064_s12 }
   0x7   :  { %17 = vsyncpa [#allocation6], 0 }
   0x8   :  { %19 = vsyncpa [#allocation6 + $0x1], 0 }
   0x9   :  { %20 = vsyncpa [#allocation9], 0 }
   0xa   :  { %22 = vsyncpa [#allocation9 + $0x1], 0 }
   0xb   :  { %23 = vsyncpa [#allocation7], 0  ;;  %s2649_s21 = smov 0   ;;  %s2651_s22 = smov 0  }
   0xc   :  { %s2653_s23 = smov 0   ;;  %s2655_s24 = smov 0  }
   0xd   :  { %s2657_s25 = smov 0   ;;  %s2659_s26 = smov 0  }
   0xe LB: > { %3079 = sst [smem:[#allocation16_spill]] %s2561_s23  ;;  %s2678_s27 = sadd.s32 4294967295, %s2573_s26   ;;  %s2573_s26 = sphi %s2659_s26, %s29_s26   ;;  %s2569_s25 = sphi %s2657_s25, %s3097_s25   ;;  %s2565_s24 = sphi %s2655_s24, %s3096_s24   ;;  %s2561_s23 = sphi %s2653_s23, %s3095_s23   ;;  %s2557_s22 = sphi %s2651_s22, %s3099_s22   ;;  %s2553_s21 = sphi %s2649_s21, %s3098_s21  }
   0xf   : > { %3080 = sst [smem:[#allocation17_spill]] %s2569_s25  ;;  %p270_p0 = scmp.ne.s32.totalorder %s2557_s22, %s2553_s21 }
  0x10   : > { %p271_p1 = scmp.eq.s32.totalorder %s2678_s27, 0  ;;  %p1922_p2 = scmp.ge.s32.totalorder %s2573_s26, 1 }
  0x11   : > { %p349_p3 = scmp.lt.s32.totalorder %s2573_s26, 4  ;;  %s3082_s11 = sld [smem:[#allocation24_spill]] }
  0x12   : > { %p2686_p4 = por %p271_p1, %p270_p0  ;;  %s2575_s15 = smov [#allocation10]  }
  0x13   : > { %p2693_p5 = pnand %p1922_p2, %p349_p3  ;;  %s401_s16 = sshll.u32 %s2575_s15, 4  ;;  %s402_s16 = int_to_ptr.vmem [resolvable:$true] %s401_s16 }
  0x14   : > { %s3065_s17 = smov 64   ;;  %s3067_s18 = smov 4  }
  0x15   : > { %p2314_p6 = pneg %p2693_p5  ;;  %s41_s19 = sadd.s32 1, %s2569_s25 }
  0x16   : > { %p43_p8 = scmp.ge.s32.totalorder %s41_s19, 3  ;;  %s257_s20 = sadd.s32 1, %s2561_s23 }
  0x17   : > { %s399_s13 = sshll.u32 %s3082_s11, 4  ;;  %p2315_p7 = pnand %p2314_p6, %p271_p1  ;;  %s400_s13 = int_to_ptr.hbm [resolvable:$true] %s399_s13 }
  0x18   : > { %p264_p9 = scmp.ne.s32.totalorder %s2561_s23, %s2557_s22  ;;  %p265_p10 = scmp.eq.s32.totalorder %s2573_s26, 0 }
  0x19   : > { %2317 = dma.hbm_to_vmem [thread:$0]  (!%p2315_p7), %s400_s13, 1024, %s402_s16, [#allocation9], %s3065_s17, %s3065_s17, %s3067_s18  }
  0x1a   : > { %s3101_s19 = smov (%p43_p8, %s41_s19), 0  ;;  %p2711_p11 = por %p265_p10, %p264_p9 }
  0x1b   : > { %3084 = sst [smem:[#allocation18_spill]] %s3101_s19  ;;  %p2326_p12 = scmp.lt.s32.totalorder %s2573_s26, 3 }
  0x1c   : > { %s254_s29 = ssub.s32 %s2569_s25, %s3101_s19  ;;  %s423_s30 = sand.u32 1, %s2561_s23  }
  0x1d   : > { %p255_p13 = scmp.eq.s32.totalorder %s254_s29, 0  ;;  %s1928_s15 = sshll.u32 %s423_s30, 6 }
  0x1e   : > { %s2189_s13 = sshll.u32 %s2569_s25, 6  ;;  %s427_s4 = scalar_lea.vmem [#allocation5], %s1928_s15 }
  0x1f   : > { %s2721_s16 = scalar_select %p255_p13, %s2561_s23, %s257_s20  }
  0x20   : > { %s432_s11 = scalar_lea.hbm %s3061_s9, %s2189_s13  ;;  %s435_s6 = sshll.u32 %s427_s4, 4  ;;  %s436_s6 = int_to_ptr.vmem [resolvable:$true] %s435_s6 }
  0x21   : > { %3086 = sst [smem:[#allocation19_spill]] %s2721_s16  ;;  %s433_s12 = sshll.u32 %s432_s11, 4  ;;  %s434_s12 = int_to_ptr.hbm [resolvable:$true] %s433_s12 }
  0x22   : > { %p2319_p0 = pnand %p2326_p12, %p2711_p11  ;;  %s454_s29 = scalar_lea.hbm %s3062_s10, %s2189_s13 }
  0x23   : > { %s449_s25 = scalar_lea.vmem [#allocation8], %s1928_s15  ;;  %s455_s16 = sshll.u32 %s454_s29, 4  ;;  %s456_s16 = int_to_ptr.hbm [resolvable:$true] %s455_s16 }
  0x24   : > { %s457_s20 = sshll.u32 %s449_s25, 4  ;;  %s424_s23 = scalar_lea.sflag [#allocation6], %s423_s30  ;;  %s458_s20 = int_to_ptr.vmem [resolvable:$true] %s457_s20 }
  0x25   : > { %s3087_s1 = smov 4   ;;  %s3088_s17 = smov 64  }
  0x26   : > { %2321 = dma.hbm_to_vmem [thread:$0]  (!%p2319_p0), %s434_s12, 1024, %s436_s6, %s424_s23, %s3088_s17, %s3088_s17, %s3087_s1  }
  0x27   : > { %s445_s4 = sand.u32 1, %s2573_s26   ;;  %469 = sbr.rel (%p2693_p5) target bundleno = 1416 (0x588), region = 68 }
  0x28   : > { %s446_s11 = scalar_lea.sflag [#allocation9], %s445_s4  ;;  %s471_s3 = sand.u32 (!%p2693_p5), 1, %s2557_s22  }
  0x29   : > { %2324 = dma.hbm_to_vmem [thread:$0]  (!%p2319_p0), %s456_s16, 1024, %s458_s20, %s446_s11, %s3088_s17, %s3088_s17, %s3087_s1  }
  0x2a   : > { %s1935_s25 = sshll.u32 (!%p2693_p5), %s471_s3, 6  ;;  %s472_s18 = scalar_lea.sflag (!%p2693_p5), [#allocation6], %s471_s3 }
  0x2b   : > { %s2743_s19 = scalar_lea.vmem (!%p2693_p5), [#allocation5], %s1935_s25 }
  0x2c   : > { %2536 = dma.done.wait (%p2686_p4), %s472_s18, 1024  }
  0x2d   : > { %2538 = vsyncadd (%p2686_p4), %s472_s18, 4294966272  ;;  %s481_s6 = sand.u32 1, %s2678_s27   ;;  %s2750_s1 = scalar_lea.vmem [#allocation8], %s1935_s25 }
  0x2e   : > { %s482_s12 = scalar_lea.sflag [#allocation9], %s481_s6 }
  0x2f   : > { %2540 = dma.done.wait (%p2686_p4), %s482_s12, 1024  }
  0x30   : > { %2542 = vsyncadd (%p2686_p4), %s482_s12, 4294966272 }
  0x31   : > { %2544 = dma.done.wait (%p271_p1), [#allocation9], 1024  }
  0x32   : > { %2546 = vsyncadd (%p271_p1), [#allocation9], 4294966272  ;;  %p565_p2 = scmp.lt.s32.totalorder %s2565_s24, 2  ;;  %p571_p3 = scmp.eq.s32.totalorder %s2565_s24, 0 }
  0x33   : > { %v593_v0 = vld [vmem:[%s3059_s7] sm:$0xf] (%p571_p3)  ;;  %vm659_vm0 = vcmask (%p571_p3), 1043456   ;;  %v2195_v3 = vld [vmem:[%s3052_s0 + $0x10] sm:$0xff] (%p571_p3)  ;;  %vm634_vm1 = vcmask (%p571_p3), 64512   ;;  %v2194_v6 = vld [vmem:[%s3052_s0 + $0x8] sm:$0xff] (%p571_p3) }
  0x34   : > { %s566_s23 = scalar_select %p565_p2, %s2565_s24, 2  ;;  %v661_v1 = vsel (%p571_p3), %vm659_vm0, %v593_v0, 0  ;;  %v2193_v2 = vld [vmem:[%s3052_s0] sm:$0xff] (%p571_p3)  ;;  %v2199_v5 = vld [vmem:[%s3052_s0 + $0x30] sm:$0xff] (%p571_p3)  ;;  %v2196_v7 = vld [vmem:[%s3052_s0 + $0x18] sm:$0xff] (%p571_p3) }
  0x35   : > { %576 = sbr.rel (!%p571_p3) target bundleno = 215 (0xd7), region = 84  ;;  %670 = vmatpush.bf16.msra.mxu0 (%p571_p3), %v661_v1  ;;  %2291 = vmatpush.bf16.msra.mxu1 (%p571_p3), %v661_v1  ;;  %v2197_v4 = vld [vmem:[%s3052_s0 + $0x20] sm:$0xff] (%p571_p3)  ;;  %v2198_v8 = vld [vmem:[%s3052_s0 + $0x28] sm:$0xff] (%p571_p3)  ;;  %v2200_v9 = vld [vmem:[%s3052_s0 + $0x38] sm:$0xff] (%p571_p3) }
  0x36   : > { %s2191_s14 = sshll.u32 %s566_s23, 6  ;;  %2292 = vmatpush.bf16.msra.mxu2 (%p571_p3), %v661_v1  ;;  %2293 = vmatpush.bf16.msra.mxu3 (%p571_p3), %v661_v1 }
  0x37   : > { %s2766_s15 = scalar_lea.vmem %s3060_s8, %s2191_s14 }
  0x38   : > { %1973 = vmatmul.msk.bf16.vlgmr.msra.gmra.mxu0 (%p571_p3), %vm634_vm1, %v2193_v2  ;;  %1975 = vmatmul.msk.bf16.vlgmr.msra.gmra.mxu1 (%p571_p3), %vm634_vm1, %v2195_v3 }
  0x39   : > { %1977 = vmatmul.msk.bf16.vlgmr.msra.gmra.mxu2 (%p571_p3), %vm634_vm1, %v2197_v4  ;;  %1979 = vmatmul.msk.bf16.vlgmr.msra.gmra.mxu3 (%p571_p3), %vm634_vm1, %v2199_v5 }
  0x48   : > { %1974 = vmatmul.msk.bf16.gmra.mxu0 %vm634_vm1, %v2194_v6  ;;  %1976 = vmatmul.msk.bf16.gmra.mxu1 %vm634_vm1, %v2196_v7 }
  0x49   : > { %1978 = vmatmul.msk.bf16.gmra.mxu2 %vm634_vm1, %v2198_v8  ;;  %1980 = vmatmul.msk.bf16.gmra.mxu3 %vm634_vm1, %v2200_v9 }
  0xb5   : > { %v672_v10 = vpop.f32.mrf.mxu0  ;;  %v682_v11 = vpop.f32.mrf.mxu1 }
  0xb6   : > { %712 = vst [vmem:[#allocation2 + $0x30] sm:$0xff] %v672_v10 }
  0xb7   : > { %716 = vst [vmem:[#allocation2 + $0x50] sm:$0xff] %v682_v11 }
  0xbc   : > { %v692_v12 = vpop.f32.mrf.mxu2  ;;  %v702_v13 = vpop.f32.mrf.mxu3 }
  0xbd   : > { %720 = vst [vmem:[#allocation2 + $0x40] sm:$0xff] %v692_v12  ;;  %v674_v14 = vpop.f32.mrf.mxu0  ;;  %v684_v15 = vpop.f32.mrf.mxu1 }
  0xbe   : > { %724 = vst [vmem:[#allocation2 + $0x60] sm:$0xff] %v702_v13 }
  0xbf   : > { %713 = vst [vmem:[#allocation2] sm:$0xff] %v674_v14 }
  0xc0   : > { %717 = vst [vmem:[#allocation2 + $0x68] sm:$0xff] %v684_v15 }
  0xc4   : > { %v694_v16 = vpop.f32.mrf.mxu2  ;;  %v704_v17 = vpop.f32.mrf.mxu3 }
  0xc5   : > { %721 = vst [vmem:[#allocation2 + $0x20] sm:$0xff] %v694_v16  ;;  %v677_v18 = vpop.f32.mrf.mxu0  ;;  %v687_v19 = vpop.f32.mrf.mxu1 }
  0xc6   : > { %725 = vst [vmem:[#allocation2 + $0x70] sm:$0xff] %v704_v17 }
  0xc7   : > { %714 = vst [vmem:[#allocation2 + $0x58] sm:$0xff] %v677_v18 }
  0xc8   : > { %718 = vst [vmem:[#allocation2 + $0x8] sm:$0xff] %v687_v19 }
  0xcc   : > { %v697_v20 = vpop.f32.mrf.mxu2  ;;  %v707_v21 = vpop.f32.mrf.mxu3 }
  0xcd   : > { %722 = vst [vmem:[#allocation2 + $0x10] sm:$0xff] %v697_v20  ;;  %v679_v22 = vpop.f32.mrf.mxu0  ;;  %v689_v23 = vpop.f32.mrf.mxu1 }
  0xce   : > { %726 = vst [vmem:[#allocation2 + $0x78] sm:$0xff] %v707_v21 }
  0xcf   : > { %715 = vst [vmem:[#allocation2 + $0x18] sm:$0xff] %v679_v22 }
  0xd0   : > { %719 = vst [vmem:[#allocation2 + $0x48] sm:$0xff] %v689_v23 }
  0xd4   : > { %v699_v24 = vpop.f32.mrf.mxu2  ;;  %v709_v25 = vpop.f32.mrf.mxu3 }
  0xd5   : > { %723 = vst [vmem:[#allocation2 + $0x38] sm:$0xff] %v699_v24 }
  0xd6   : > { %727 = vst [vmem:[#allocation2 + $0x28] sm:$0xff] %v709_v25 }
  0xd7 PF: > { %v2208_v26 = vld [vmem:[%s2766_s15 + $0x38] sm:$0xff]  ;;  %v2207_v27 = vld [vmem:[%s2766_s15 + $0x30] sm:$0xff]  ;;  %v2206_v28 = vld [vmem:[%s2766_s15 + $0x28] sm:$0xff]  ;;  %v2578_v53 = vmov 0   ;;  %s3089_s12 = sld [smem:[#allocation20_spill]]  ;;  %vm1227_vm10 = vcmask 261120  }
  0xd8   : > { %835 = vmatpush.bf16.msra.mxu0 %v2208_v26  ;;  %v2205_v29 = vld [vmem:[%s2766_s15 + $0x20] sm:$0xff]  ;;  %v2204_v30 = vld [vmem:[%s2766_s15 + $0x18] sm:$0xff]  ;;  %v2203_v31 = vld [vmem:[%s2766_s15 + $0x10] sm:$0xff]  ;;  %2387 = vset.pattern.permute.xlu0 %v2578_v53  ;;  %s3090_s30 = sld [smem:[#allocation21_spill]]  ;;  %p1633_p1 = scmp.eq.s32.totalorder %s2565_s24, 2 }
  0xd9   : > { %v2202_v32 = vld [vmem:[%s2766_s15 + $0x8] sm:$0xff]  ;;  %v2201_v33 = vld [vmem:[%s2766_s15] sm:$0xff]  ;;  %v2811_v34 = vld [vmem:[#allocation2 + $0x30] sm:$0xff]  ;;  %2388 = vset.pattern.permute.xlu1 %v2578_v53  ;;  %2389 = vset.pattern.permute.xlu2 %v2578_v53  ;;  %s3091_s23 = sld [smem:[#allocation23_spill]] (%p1633_p1) }
  0xda   : > { %v2813_v35 = vld [vmem:[#allocation2] sm:$0xff]  ;;  %v2817_v37 = vld [vmem:[#allocation2 + $0x58] sm:$0xff]  ;;  %v2823_v40 = vld [vmem:[#allocation2 + $0x50] sm:$0xff] }
  0xdb   : > { %v763_v36 = vpack.c.bf16 %v2813_v35, %v2811_v34  ;;  %v2819_v38 = vld [vmem:[#allocation2 + $0x18] sm:$0xff]  ;;  %v2825_v41 = vld [vmem:[#allocation2 + $0x68] sm:$0xff]  ;;  %v2835_v46 = vld [vmem:[#allocation2 + $0x40] sm:$0xff] }
  0xdc   : > { %836 = vmatpush.bf16.msra.mxu0 %v2207_v27  ;;  %v764_v39 = vpack.c.bf16 %v2819_v38, %v2817_v37  ;;  %v765_v42 = vpack.c.bf16 %v2825_v41, %v2823_v40  ;;  %v2829_v43 = vld [vmem:[#allocation2 + $0x8] sm:$0xff]  ;;  %v2837_v47 = vld [vmem:[#allocation2 + $0x20] sm:$0xff]  ;;  %v2841_v49 = vld [vmem:[#allocation2 + $0x10] sm:$0xff] }
  0xdd   : > { %v2831_v44 = vld [vmem:[#allocation2 + $0x48] sm:$0xff]  ;;  %v767_v48 = vpack.c.bf16 %v2837_v47, %v2835_v46  ;;  %v2843_v50 = vld [vmem:[#allocation2 + $0x38] sm:$0xff]  ;;  %v918_v52 = vld [vmem:[%s3054_s2] sm:$0xff] }
  0xde   : > { %v766_v45 = vpack.c.bf16 %v2831_v44, %v2829_v43  ;;  %v768_v51 = vpack.c.bf16 %v2843_v50, %v2841_v49  ;;  %923 = vperm.xlu0 %2387, %v918_v52   ;;  %v919_v54 = vld [vmem:[%s3054_s2 + $0x8] sm:$0xff]  ;;  %v2853_v55 = vld [vmem:[#allocation2 + $0x60] sm:$0xff]  ;;  %v2855_v56 = vld [vmem:[#allocation2 + $0x70] sm:$0xff] }
  0xdf   : > { %v769_v57 = vpack.c.bf16 %v2855_v56, %v2853_v55  ;;  %v920_v58 = vld [vmem:[%s3054_s2 + $0x10] sm:$0xff]  ;;  %v921_v60 = vld [vmem:[%s3054_s2 + $0x18] sm:$0xff]  ;;  %v2873_v63 = vld [vmem:[#allocation2 + $0x28] sm:$0xff] }
  0xe0   : > { %837 = vmatpush.bf16.msra.mxu0 %v2206_v28  ;;  %929 = vperm.xlu1 %2388, %v920_v58   ;;  %v1354_v59 = vld [vmem:[%s3057_s5 + $0x10] sm:$0xff]  ;;  %v1363_v61 = vld [vmem:[%s3057_s5 + $0x58] sm:$0xff]  ;;  %v1364_v2 = vld [vmem:[%s3057_s5 + $0x60] sm:$0xff] }
  0xe1   : > { %v2871_v62 = vld [vmem:[#allocation2 + $0x78] sm:$0xff]  ;;  %v1356_v3 = vld [vmem:[%s3057_s5 + $0x20] sm:$0xff]  ;;  %v1365_v6 = vld [vmem:[%s3057_s5 + $0x68] sm:$0xff] }
  0xe2   : > { %v770_v0 = vpack.c.bf16 %v2873_v63, %v2871_v62  ;;  %v1355_v1 = vld [vmem:[%s3057_s5 + $0x18] sm:$0xff]  ;;  %v1360_v7 = vld [vmem:[%s3057_s5 + $0x40] sm:$0xff]  ;;  %v1366_v10 = vld [vmem:[%s3057_s5 + $0x70] sm:$0xff] }
  0xe3   : > { %v1359_v4 = vld [vmem:[%s3057_s5 + $0x38] sm:$0xff]  ;;  %v1361_v12 = vld [vmem:[%s3057_s5 + $0x48] sm:$0xff]  ;;  %v2219_v52 = vld [vmem:[%s2743_s19] sm:$0xff] }
  0xe4   : > { %838 = vmatpush.bf16.msra.mxu0 %v2205_v29  ;;  %v2226_v27 = vld [vmem:[%s2743_s19 + $0x38] sm:$0xff]  ;;  %v2225_v29 = vld [vmem:[%s2743_s19 + $0x30] sm:$0xff]  ;;  %v2217_v53 = vld [vmem:[%s3089_s12] sm:$0xff] }
  0xe5   : > { %1044 = vmatpush.bf16.msra.mxu1 %v2226_v27 }
  0xe6   : > { %926 = vperm.xlu0 %2387, %v919_v54  }
  0xe8   : > { %839 = vmatpush.bf16.msra.mxu0 %v2204_v30  ;;  %932 = vperm.xlu1 %2388, %v921_v60  }
  0xe9   : > { %1045 = vmatpush.bf16.msra.mxu1 %v2225_v29 }
  0xec   : > { %840 = vmatpush.bf16.msra.mxu0 %v2203_v31  ;;  %v2224_v31 = vld [vmem:[%s2743_s19 + $0x28] sm:$0xff] }
  0xed   : > { %1046 = vmatpush.bf16.msra.mxu1 %v2224_v31 }
  0xee   : > { %1380 = vperm.xlu0 %2387, %v1354_v59   ;;  %v2218_v59 = vld [vmem:[%s3089_s12 + $0x8] sm:$0xff] }
  0xf0   : > { %841 = vmatpush.bf16.msra.mxu0 %v2202_v32  ;;  %1385 = vperm.xlu1 %2388, %v1355_v1  }
  0xf4   : > { %842 = vmatpush.bf16.msra.mxu0 %v2201_v33  ;;  %v2223_v33 = vld [vmem:[%s2743_s19 + $0x20] sm:$0xff] }
  0xf5   : > { %1047 = vmatpush.bf16.msra.mxu1 %v2223_v33 }
  0xf6   : > { %1425 = vperm.xlu0 %2387, %v1363_v61  }
  0xf7   : > { %843 = vmatmul.bf16.vlgmr.msra.gmra.mxu0 %v763_v36 }
  0xf8   : > { %1390 = vperm.xlu1 %2388, %v1356_v3  }
  0xfe   : > { %1430 = vperm.xlu0 %2387, %v1364_v2   ;;  %v916_v2 = vlaneseq }
 0x100   : > { %1435 = vperm.xlu1 %2388, %v1365_v6  }
 0x106   : > { %1405 = vperm.xlu0 %2387, %v1359_v4   ;;  %v917_v4 = vand.u32 127, %v916_v2 }
 0x107   : > { %848 = vmatmul.bf16.gmra.mxu0 %v764_v39  ;;  %v2222_v39 = vld [vmem:[%s2743_s19 + $0x18] sm:$0xff] }
 0x108   : > { %1440 = vperm.xlu1 %2388, %v1366_v10   ;;  %1048 = vmatpush.bf16.msra.mxu1 %v2222_v39  ;;  %v1352_v39 = vld [vmem:[%s3057_s5] sm:$0xff] }
 0x109   : > { %1370 = vperm.xlu2 %2389, %v1352_v39  }
 0x10e   : > { %1410 = vperm.xlu0 %2387, %v1360_v7   ;;  %v2579_v7 = vmov 1.0|1.0  }
 0x110   : > { %1415 = vperm.xlu1 %2388, %v1361_v12  }
 0x117   : > { %853 = vmatmul.bf16.gmra.mxu0 %v765_v42  ;;  %v2221_v42 = vld [vmem:[%s2743_s19 + $0x10] sm:$0xff] }
 0x118   : > { %1049 = vmatpush.bf16.msra.mxu1 %v2221_v42 }
 0x127   : > { %858 = vmatmul.bf16.gmra.mxu0 %v766_v45 }
 0x137   : > { %863 = vmatmul.bf16.gmra.mxu0 %v767_v48  ;;  %v2220_v48 = vld [vmem:[%s2743_s19 + $0x8] sm:$0xff]  ;;  %s3092_s19 = sld [smem:[#allocation22_spill]] (%p1633_p1) }
 0x138   : > { %1050 = vmatpush.bf16.msra.mxu1 %v2220_v48 }
 0x13c   : > { %1051 = vmatpush.bf16.msra.mxu1 %v2219_v52 }
 0x13f   : > { %1052 = vmatmul.bf16.vlgmr.msra.gmra.mxu1 %v2217_v53  ;;  %v1353_v53 = vld [vmem:[%s3057_s5 + $0x8] sm:$0xff] }
 0x140   : > { %1375 = vperm.xlu2 %2389, %v1353_v53  }
 0x147   : > { %868 = vmatmul.bf16.gmra.mxu0 %v768_v51 }
 0x14f   : > { %1057 = vmatmul.bf16.gmra.mxu1 %v2218_v59 }
 0x157   : > { %873 = vmatmul.bf16.gmra.mxu0 %v769_v57 }
 0x167   : > { %878 = vmatmul.bf16.gmra.mxu0 %v770_v0  ;;  %v924_v0 = vpop.permute.xlu0 %923 }
 0x168   : > { %vm934_vm2 = vcmp.eq.s32.totalorder %v917_v4, %v924_v0 }
 0x174   : > { %v844_v5 = vpop.f32.mrf.mxu0 }
 0x17c   : > { %v846_v8 = vpop.f32.mrf.mxu0 }
 0x17d   : > { %v2247_v9 = vpack.c.bf16 %v846_v8, %v844_v5  ;;  %v927_v5 = vpop.permute.xlu0 %926  ;;  %v930_v8 = vpop.permute.xlu1 %929 }
 0x17e   : > { %vm935_vm3 = vcmp.eq.s32.totalorder %v917_v4, %v927_v5  ;;  %vm936_vm5 = vcmp.eq.s32.totalorder %v917_v4, %v930_v8 }
 0x17f   : > { %2248 = vst [vmem:[#allocation3 + $0x28] sm:$0xff] %v2247_v9   ;;  %vm2089_vm4 = vmpackc.low %vm935_vm3, %vm934_vm2 }
 0x184   : > { %v849_v11 = vpop.f32.mrf.mxu0 }
 0x185   : > { %v933_v9 = vpop.permute.xlu1 %932 }
 0x186   : > { %v2209_v6 = vld [vmem:[#allocation3 + $0x28] sm:$0xff]  ;;  %vm937_vm6 = vcmp.eq.s32.totalorder %v917_v4, %v933_v9  ;;  %v1367_v9 = vld [vmem:[%s3057_s5 + $0x78] sm:$0xff] }
 0x187   : > { %vm2091_vm7 = vmpackc.low %vm937_vm6, %vm936_vm5 }
 0x18c   : > { %v851_v13 = vpop.f32.mrf.mxu0 }
 0x18d   : > { %v2252_v14 = vpack.c.bf16 %v851_v13, %v849_v11 }
 0x18f   : > { %2284 = vst [vmem:[#allocation3] sm:$0xff] %v2252_v14  }
 0x194   : > { %v854_v15 = vpop.f32.mrf.mxu0 }
 0x196   : > { %v2210_v3 = vld [vmem:[#allocation3] sm:$0xff] }
 0x19c   : > { %v856_v16 = vpop.f32.mrf.mxu0 }
 0x19d   : > { %v2257_v17 = vpack.c.bf16 %v856_v16, %v854_v15  ;;  %v2915_v16 = vshrl.u32 %v916_v2, 7  ;;  %v1357_v2 = vld [vmem:[%s3057_s5 + $0x28] sm:$0xff] }
 0x19f   : > { %2285 = vst [vmem:[#allocation3 + $0x10] sm:$0xff] %v2257_v17   ;;  %v1138_v42 = vadd.s32 16, %v2915_v16  ;;  %v1142_v0 = vadd.s32 48, %v2915_v16  ;;  %v1145_v8 = vadd.s32 72, %v2915_v16 }
 0x1a4   : > { %v859_v18 = vpop.f32.mrf.mxu0 }
 0x1a6   : > { %v2211_v1 = vld [vmem:[#allocation3 + $0x10] sm:$0xff] }
 0x1ac   : > { %v861_v19 = vpop.f32.mrf.mxu0 }
 0x1ad   : > { %v2262_v20 = vpack.c.bf16 %v861_v19, %v859_v18 }
 0x1af   : > { %2286 = vst [vmem:[#allocation3 + $0x20] sm:$0xff] %v2262_v20   ;;  %v1137_v20 = vadd.s32 8, %v2915_v16 }
 0x1b4   : > { %v864_v21 = vpop.f32.mrf.mxu0 }
 0x1b6   : > { %v2212_v61 = vld [vmem:[#allocation3 + $0x20] sm:$0xff] }
 0x1bc   : > { %v866_v22 = vpop.f32.mrf.mxu0  ;;  %v1053_v10 = vpop.f32.mrf.mxu1 }
 0x1bd   : > { %v2267_v23 = vpack.c.bf16 %v866_v22, %v864_v21  ;;  %v2921_v21 = vld [vmem:[%s3090_s30] ss:$0 sm:$0xff] }
 0x1be   : > { %vm1153_vm8 = vcmp.eq.s32.totalorder %v2915_v16, %v2921_v21  ;;  %vm1154_vm9 = vcmp.eq.s32.totalorder %v1137_v20, %v2921_v21  ;;  %vm1155_vm11 = vcmp.eq.s32.totalorder %v1138_v42, %v2921_v21  ;;  %vm1159_vm15 = vcmp.eq.s32.totalorder %v1142_v0, %v2921_v21  ;;  %v2233_v20 = vld [vmem:[%s2750_s1 + $0x30] sm:$0xff] }
 0x1bf   : > { %2287 = vst [vmem:[#allocation3 + $0x18] sm:$0xff] %v2267_v23   ;;  %vm1162_vm2 = vcmp.eq.s32.totalorder %v1145_v8, %v2921_v21 }
 0x1c4   : > { %v869_v24 = vpop.f32.mrf.mxu0  ;;  %v1055_v12 = vpop.f32.mrf.mxu1 }
 0x1c6   : > { %v2213_v60 = vld [vmem:[#allocation3 + $0x18] sm:$0xff] }
 0x1cc   : > { %v871_v25 = vpop.f32.mrf.mxu0  ;;  %v1058_v14 = vpop.f32.mrf.mxu1 }
 0x1cd   : > { %v2272_v26 = vpack.c.bf16 %v871_v25, %v869_v24 }
 0x1cf   : > { %2288 = vst [vmem:[#allocation3 + $0x8] sm:$0xff] %v2272_v26  }
 0x1d4   : > { %v874_v28 = vpop.f32.mrf.mxu0  ;;  %v1060_v18 = vpop.f32.mrf.mxu1 }
 0x1d6   : > { %v2214_v58 = vld [vmem:[#allocation3 + $0x8] sm:$0xff] }
 0x1dc   : > { %v876_v30 = vpop.f32.mrf.mxu0 }
 0x1dd   : > { %v2277_v32 = vpack.c.bf16 %v876_v30, %v874_v28  ;;  %v2580_v30 = vmov 0.0  }
 0x1de   : > { %v2093_v31 = vsel %vm1153_vm8, 1.0, %v2580_v30  ;;  %v2095_v48 = vsel %vm1155_vm11, 1.0, %v2580_v30 }
 0x1df   : > { %2289 = vst [vmem:[#allocation3 + $0x38] sm:$0xff] %v2277_v32   ;;  %v2094_v32 = vsel %vm1154_vm9, 1.0, %v2580_v30 }
 0x1e4   : > { %v879_v36 = vpop.f32.mrf.mxu0 }
 0x1e6   : > { %v2215_v57 = vld [vmem:[#allocation3 + $0x38] sm:$0xff] }
 0x1ec   : > { %v881_v45 = vpop.f32.mrf.mxu0 }
 0x1ed   : > { %v2282_v51 = vpack.c.bf16 %v881_v45, %v879_v36  ;;  %v1201_v36 = vpack.c.bf16 %v2094_v32, %v2093_v31  ;;  %v1139_v45 = vadd.s32 24, %v2915_v16  ;;  %v1150_v31 = vadd.s32 112, %v2915_v16 }
 0x1ee   : > { %v1151_v32 = vadd.s32 120, %v2915_v16 }
 0x1ef   : > { %2290 = vst [vmem:[#allocation3 + $0x30] sm:$0xff] %v2282_v51   ;;  %vm1156_vm12 = vcmp.eq.s32.totalorder %v1139_v45, %v2921_v21  ;;  %v2227_v45 = vld [vmem:[%s2750_s1] sm:$0xff] }
 0x1f0   : > { %v2096_v51 = vsel %vm1156_vm12, 1.0, %v2580_v30  ;;  %vm1168_vm8 = vcmp.eq.s32.totalorder %v1151_v32, %v2921_v21 }
 0x1f1   : > { %v1202_v52 = vpack.c.bf16 %v2096_v51, %v2095_v48  ;;  %v2108_v42 = vsel %vm1168_vm8, 1.0, %v2580_v30  ;;  %v1371_v51 = vpop.permute.xlu2 %1370 }
 0x1f6   : > { %v2216_v54 = vld [vmem:[#allocation3 + $0x30] sm:$0xff] }
 0x1f7   : > { %1111 = vmatpush.bf16.msra.mxu2 %v2216_v54  ;;  %v1140_v54 = vadd.s32 32, %v2915_v16 }
 0x1f9   : > { %vm1157_vm13 = vcmp.eq.s32.totalorder %v1140_v54, %v2921_v21  ;;  %v1376_v53 = vpop.permute.xlu2 %1375 }
 0x1fb   : > { %1112 = vmatpush.bf16.msra.mxu2 %v2215_v57  ;;  %v1141_v57 = vadd.s32 40, %v2915_v16 }
 0x1fd   : > { %vm1158_vm14 = vcmp.eq.s32.totalorder %v1141_v57, %v2921_v21 }
 0x1fe   : > { %v2098_v59 = vsel %vm1158_vm14, 1.0, %v2580_v30 }
 0x1ff   : > { %1113 = vmatpush.bf16.msra.mxu2 %v2214_v58  ;;  %v2097_v58 = vsel %vm1157_vm13, 1.0, %v2580_v30 }
 0x203   : > { %1114 = vmatpush.bf16.msra.mxu2 %v2213_v60  ;;  %v1203_v60 = vpack.c.bf16 %v2098_v59, %v2097_v58 }
 0x207   : > { %1115 = vmatpush.bf16.msra.mxu2 %v2212_v61  ;;  %v1362_v61 = vld [vmem:[%s3057_s5 + $0x50] sm:$0xff] }
 0x208   : > { %1420 = vperm.xlu2 %2389, %v1362_v61   ;;  %v1386_v61 = vpop.permute.xlu1 %1385 }
 0x20b   : > { %1116 = vmatpush.bf16.msra.mxu2 %v2211_v1  ;;  %v1143_v1 = vadd.s32 56, %v2915_v16 }
 0x20d   : > { %vm1160_vm0 = vcmp.eq.s32.totalorder %v1143_v1, %v2921_v21 }
 0x20e   : > { %v2100_v4 = vsel %vm1160_vm0, 1.0, %v2580_v30 }
 0x20f   : > { %1117 = vmatpush.bf16.msra.mxu2 %v2210_v3  ;;  %v2099_v3 = vsel %vm1159_vm15, 1.0, %v2580_v30 }
 0x210   : > { %1395 = vperm.xlu2 %2389, %v1357_v2   ;;  %v1204_v5 = vpack.c.bf16 %v2100_v4, %v2099_v3 }
 0x213   : > { %1118 = vmatpush.bf16.msra.mxu2 %v2209_v6  ;;  %v1358_v6 = vld [vmem:[%s3057_s5 + $0x30] sm:$0xff] }
 0x216   : > { %2090 = vmatmul.msk.bf16.vlgmr.msra.gmra.mxu2 %vm2089_vm4, %v2579_v7 }
 0x218   : > { %1400 = vperm.xlu2 %2389, %v1358_v6   ;;  %v1391_v6 = vpop.permute.xlu1 %1390 }
 0x220   : > { %1445 = vperm.xlu2 %2389, %v1367_v9  }
 0x226   : > { %2092 = vmatmul.msk.bf16.gmra.mxu2 %vm2091_vm7, %v2579_v7  ;;  %v1144_v7 = vadd.s32 64, %v2915_v16  ;;  %vm1167_vm7 = vcmp.eq.s32.totalorder %v1150_v31, %v2921_v21 }
 0x227   : > { %v2107_v39 = vsel %vm1167_vm7, 1.0, %v2580_v30 }
 0x228   : > { %vm1161_vm1 = vcmp.eq.s32.totalorder %v1144_v7, %v2921_v21  ;;  %v1208_v48 = vpack.c.bf16 %v2108_v42, %v2107_v39 }
 0x262   : > { %v1421_v3 = vpop.permute.xlu2 %1420 }
 0x26a   : > { %v1396_v7 = vpop.permute.xlu2 %1395 }
 0x299   : > { %v1120_v11 = vpop.f32.mrf.mxu2 }
 0x29a   : > { %v1121_v24 = vadd.f32 %v1120_v11, %v1053_v10  ;;  %v2101_v10 = vsel %vm1161_vm1, 1.0, %v2580_v30  ;;  %v2102_v11 = vsel %vm1162_vm2, 1.0, %v2580_v30 }
 0x29c   : > { %v1130_v29 = vmax.f32 %v1121_v24, 0.0  ;;  %v2232_v24 = vld [vmem:[%s2750_s1 + $0x28] sm:$0xff] }
 0x2a1   : > { %v1122_v13 = vpop.f32.mrf.mxu2 }
 0x2a2   : > { %v1123_v22 = vadd.f32 %v1122_v13, %v1055_v12  ;;  %v1205_v12 = vpack.c.bf16 %v2102_v11, %v2101_v10  ;;  %v1146_v13 = vadd.s32 80, %v2915_v16 }
 0x2a4   : > { %v1131_v27 = vmax.f32 %v1123_v22, 0.0  ;;  %vm1163_vm3 = vcmp.eq.s32.totalorder %v1146_v13, %v2921_v21  ;;  %v1148_v22 = vadd.s32 96, %v2915_v16 }
 0x2a6   : > { %v1225_v33 = vpack.c.bf16 %v1131_v27, %v1130_v29  ;;  %vm1165_vm5 = vcmp.eq.s32.totalorder %v1148_v22, %v2921_v21  ;;  %v2231_v27 = vld [vmem:[%s2750_s1 + $0x20] sm:$0xff]  ;;  %v2230_v29 = vld [vmem:[%s2750_s1 + $0x18] sm:$0xff] }
 0x2a9   : > { %v1125_v15 = vpop.f32.mrf.mxu2 }
 0x2aa   : > { %v1126_v17 = vadd.f32 %v1125_v15, %v1058_v14  ;;  %v1147_v14 = vadd.s32 88, %v2915_v16  ;;  %v2103_v15 = vsel %vm1163_vm3, 1.0, %v2580_v30 }
 0x2ac   : > { %v1132_v25 = vmax.f32 %v1126_v17, 0.0  ;;  %vm1164_vm4 = vcmp.eq.s32.totalorder %v1147_v14, %v2921_v21  ;;  %v1436_v14 = vpop.permute.xlu1 %1435 }
 0x2ad   : > { %v2104_v17 = vsel %vm1164_vm4, 1.0, %v2580_v30 }
 0x2b1   : > { %v1127_v19 = vpop.f32.mrf.mxu2 }
 0x2b2   : > { %v1128_v23 = vadd.f32 %v1127_v19, %v1060_v18  ;;  %v1206_v18 = vpack.c.bf16 %v2104_v17, %v2103_v15  ;;  %v2234_v19 = vld [vmem:[%s2750_s1 + $0x38] sm:$0xff]  ;;  %v1401_v17 = vpop.permute.xlu2 %1400 }
 0x2b3   : > { %1552 = vmatpush.bf16.msrb.mxu1 %v2234_v19  ;;  %2294 = vmatpush.bf16.msrb.mxu2 %v2234_v19 }
 0x2b4   : > { %v1133_v26 = vmax.f32 %v1128_v23, 0.0  ;;  %v1149_v23 = vadd.s32 104, %v2915_v16 }
 0x2b6   : > { %v1226_v28 = vpack.c.bf16 %v1133_v26, %v1132_v25  ;;  %vm1166_vm6 = vcmp.eq.s32.totalorder %v1149_v23, %v2921_v21  ;;  %v2105_v25 = vsel %vm1165_vm5, 1.0, %v2580_v30  ;;  %v1441_v23 = vpop.permute.xlu1 %1440 }
 0x2b7   : > { %1553 = vmatpush.bf16.msrb.mxu1 %v2233_v20  ;;  %2295 = vmatpush.bf16.msrb.mxu2 %v2233_v20  ;;  %v2106_v26 = vsel %vm1166_vm6, 1.0, %v2580_v30 }
 0x2b8   : > { %1258 = vmatpush.bf16.msra.mxu3 %v1226_v28  ;;  %v1207_v28 = vpack.c.bf16 %v2106_v26, %v2105_v25 }
 0x2bb   : > { %1554 = vmatpush.bf16.msrb.mxu1 %v2232_v24  ;;  %2296 = vmatpush.bf16.msrb.mxu2 %v2232_v24 }
 0x2bc   : > { %1259 = vmatpush.bf16.msra.mxu3 %v1225_v33  ;;  %v2229_v33 = vld [vmem:[%s2750_s1 + $0x10] sm:$0xff] }
 0x2be   : > { %v1416_v26 = vpop.permute.xlu1 %1415 }
 0x2bf   : > { %2109 = vmatmul.msk.bf16.vlgmr.msra.gmra.mxu3 %vm1227_vm10, %v1201_v36  ;;  %1555 = vmatpush.bf16.msrb.mxu1 %v2231_v27  ;;  %v2228_v36 = vld [vmem:[%s2750_s1 + $0x8] sm:$0xff] }
 0x2c0   : > { %2297 = vmatpush.bf16.msrb.mxu2 %v2231_v27 }
 0x2c3   : > { %1556 = vmatpush.bf16.msrb.mxu1 %v2230_v29 }
 0x2c4   : > { %2298 = vmatpush.bf16.msrb.mxu2 %v2230_v29 }
 0x2c7   : > { %1557 = vmatpush.bf16.msrb.mxu1 %v2229_v33 }
 0x2c8   : > { %2299 = vmatpush.bf16.msrb.mxu2 %v2229_v33 }
 0x2cb   : > { %1558 = vmatpush.bf16.msrb.mxu1 %v2228_v36 }
 0x2cc   : > { %2300 = vmatpush.bf16.msrb.mxu2 %v2228_v36 }
 0x2cf   : > { %2110 = vmatmul.msk.bf16.gmra.mxu3 %vm1227_vm10, %v1202_v52  ;;  %1559 = vmatpush.bf16.msrb.mxu1 %v2227_v45 }
 0x2d0   : > { %2301 = vmatpush.bf16.msrb.mxu2 %v2227_v45 }
 0x2df   : > { %2111 = vmatmul.msk.bf16.gmra.mxu3 %vm1227_vm10, %v1203_v60  ;;  %v1381_v60 = vpop.permute.xlu0 %1380 }
 0x2ef   : > { %2112 = vmatmul.msk.bf16.gmra.mxu3 %vm1227_vm10, %v1204_v5  ;;  %v1426_v5 = vpop.permute.xlu0 %1425 }
 0x2ff   : > { %2113 = vmatmul.msk.bf16.gmra.mxu3 %vm1227_vm10, %v1205_v12  ;;  %v1431_v12 = vpop.permute.xlu0 %1430 }
 0x307   : > { %v1406_v15 = vpop.permute.xlu0 %1405 }
 0x30f   : > { %2114 = vmatmul.msk.bf16.gmra.mxu3 %vm1227_vm10, %v1206_v18  ;;  %v1411_v25 = vpop.permute.xlu0 %1410 }
 0x31f   : > { %2115 = vmatmul.msk.bf16.gmra.mxu3 %vm1227_vm10, %v1207_v28 }
 0x32f   : > { %2116 = vmatmul.msk.bf16.gmra.mxu3 %vm1227_vm10, %v1208_v48 }
 0x342   : > { %v1261_v52 = vpop.f32.mrf.mxu3 }
 0x343   : > { %v1448_v57 = vmul.f32 %v1371_v51, %v1261_v52 }
 0x34a   : > { %v1263_v54 = vpop.f32.mrf.mxu3 }
 0x34b   : > { %v1449_v58 = vmul.f32 %v1376_v53, %v1263_v54 }
 0x34d   : > { %v1480_v59 = vpack.c.bf16 %v1449_v58, %v1448_v57  ;;  %v1446_v57 = vpop.permute.xlu2 %1445 }
 0x34f   : > { %1560 = vmatmul.bf16.vlgmr.msrb.gmra.mxu1 %v1480_v59 }
 0x352   : > { %v1266_v21 = vpop.f32.mrf.mxu3 }
 0x353   : > { %v1450_v0 = vmul.f32 %v1381_v60, %v1266_v21 }
 0x35a   : > { %v1268_v30 = vpop.f32.mrf.mxu3 }
 0x35b   : > { %v1451_v1 = vmul.f32 %v1386_v61, %v1268_v30 }
 0x35d   : > { %v1481_v2 = vpack.c.bf16 %v1451_v1, %v1450_v0 }
 0x35f   : > { %1565 = vmatmul.bf16.gmra.mxu1 %v1481_v2 }
 0x362   : > { %v1271_v4 = vpop.f32.mrf.mxu3 }
 0x363   : > { %v1452_v9 = vmul.f32 %v1391_v6, %v1271_v4 }
 0x36a   : > { %v1273_v8 = vpop.f32.mrf.mxu3 }
 0x36b   : > { %v1453_v10 = vmul.f32 %v1396_v7, %v1273_v8 }
 0x36d   : > { %v1482_v11 = vpack.c.bf16 %v1453_v10, %v1452_v9 }
 0x36f   : > { %1570 = vmatmul.bf16.gmra.mxu1 %v1482_v11 }
 0x372   : > { %v1276_v13 = vpop.f32.mrf.mxu3 }
 0x373   : > { %v1454_v19 = vmul.f32 %v1401_v17, %v1276_v13 }
 0x37a   : > { %v1278_v18 = vpop.f32.mrf.mxu3 }
 0x37b   : > { %v1455_v20 = vmul.f32 %v1406_v15, %v1278_v18 }
 0x37d   : > { %v1483_v22 = vpack.c.bf16 %v1455_v20, %v1454_v19 }
 0x37f   : > { %1575 = vmatmul.bf16.gmra.mxu1 %v1483_v22 }
 0x382   : > { %v1281_v24 = vpop.f32.mrf.mxu3 }
 0x383   : > { %v1456_v28 = vmul.f32 %v1411_v25, %v1281_v24 }
 0x38a   : > { %v1283_v27 = vpop.f32.mrf.mxu3 }
 0x38b   : > { %v1457_v29 = vmul.f32 %v1416_v26, %v1283_v27 }
 0x38d   : > { %v1484_v31 = vpack.c.bf16 %v1457_v29, %v1456_v28 }
 0x38f   : > { %1580 = vmatmul.bf16.gmra.mxu1 %v1484_v31  ;;  %v2242_v31 = vld [vmem:[#allocation10 + $0x30] sm:$0xff] (%p1633_p1) }
 0x392   : > { %v1286_v32 = vpop.f32.mrf.mxu3 }
 0x393   : > { %v1458_v36 = vmul.f32 %v1421_v3, %v1286_v32 }
 0x39a   : > { %v1288_v33 = vpop.f32.mrf.mxu3 }
 0x39b   : > { %v1459_v39 = vmul.f32 %v1426_v5, %v1288_v33 }
 0x39d   : > { %v1485_v42 = vpack.c.bf16 %v1459_v39, %v1458_v36  ;;  %v2241_v39 = vld [vmem:[#allocation10 + $0x28] sm:$0xff] (%p1633_p1) }
 0x39f   : > { %1585 = vmatmul.bf16.vlgmr.msrb.gmra.mxu2 %v1485_v42 }
 0x3a2   : > { %v1291_v45 = vpop.f32.mrf.mxu3 }
 0x3a3   : > { %v1460_v51 = vmul.f32 %v1431_v12, %v1291_v45 }
 0x3aa   : > { %v1293_v48 = vpop.f32.mrf.mxu3 }
 0x3ab   : > { %v1461_v52 = vmul.f32 %v1436_v14, %v1293_v48 }
 0x3ad   : > { %v1486_v53 = vpack.c.bf16 %v1461_v52, %v1460_v51  ;;  %v2240_v51 = vld [vmem:[#allocation10 + $0x20] sm:$0xff] (%p1633_p1) }
 0x3af   : > { %1590 = vmatmul.bf16.gmra.mxu2 %v1486_v53 }
 0x3b2   : > { %v1296_v54 = vpop.f32.mrf.mxu3 }
 0x3b3   : > { %v1462_v59 = vmul.f32 %v1441_v23, %v1296_v54 }
 0x3ba   : > { %v1298_v58 = vpop.f32.mrf.mxu3 }
 0x3bb   : > { %v1463_v21 = vmul.f32 %v1446_v57, %v1298_v58  ;;  %v2239_v57 = vld [vmem:[#allocation10 + $0x18] sm:$0xff] (%p1633_p1) }
 0x3bd   : > { %v1487_v60 = vpack.c.bf16 %v1463_v21, %v1462_v59 }
 0x3bf   : > { %1595 = vmatmul.bf16.gmra.mxu2 %v1487_v60  ;;  %v2392_v60 = vld [vmem:[%s3092_s19] ss:$0 sm:$0xff] (%p1633_p1) }
 0x3c0   : > { %vm1640_vm9 = vcmp.eq.s32.totalorder (%p1633_p1), %v2915_v16, %v2392_v60 }
 0x3c1   : > { %vm2151_vm10 = vmpackc.low (%p1633_p1), %vm1640_vm9, %vm1640_vm9 }
 0x3cc   : > { %v1561_v61 = vpop.f32.mrf.mxu1 }
 0x3cd   : > { %v1601_v30 = vadd.f32 %v1561_v61, %v2811_v34  ;;  %v2238_v61 = vld [vmem:[#allocation10 + $0x10] sm:$0xff] (%p1633_p1) }
 0x3cf   : > { %1617 = vst [vmem:[#allocation2 + $0x30] sm:$0xff] %v1601_v30 }
 0x3d4   : > { %v1563_v0 = vpop.f32.mrf.mxu1 }
 0x3d5   : > { %v1602_v1 = vadd.f32 %v1563_v0, %v2813_v35  ;;  %v2237_v0 = vld [vmem:[#allocation10 + $0x8] sm:$0xff] (%p1633_p1) }
 0x3d6   : > { %v1644_v59 = vld [vmem:[#allocation2 + $0x30] sm:$0xff] (%p1633_p1) }
 0x3d7   : > { %1618 = vst [vmem:[#allocation2] sm:$0xff] %v1602_v1  ;;  %v2582_v1 = vmov (%p1633_p1), 1.0|1.0  }
 0x3dc   : > { %v1566_v2 = vpop.f32.mrf.mxu1 }
 0x3dd   : > { %v1603_v3 = vadd.f32 %v1566_v2, %v2817_v37  ;;  %v2236_v2 = vld [vmem:[#allocation10] sm:$0xff] (%p1633_p1) }
 0x3de   : > { %v1645_v21 = vld [vmem:[#allocation2] sm:$0xff] (%p1633_p1) }
 0x3df   : > { %1619 = vst [vmem:[#allocation2 + $0x58] sm:$0xff] %v1603_v3  ;;  %v1660_v30 = vpack.c.bf16 (%p1633_p1), %v1645_v21, %v1644_v59 }
 0x3e4   : > { %v1568_v4 = vpop.f32.mrf.mxu1 }
 0x3e5   : > { %v1604_v5 = vadd.f32 %v1568_v4, %v2819_v38 }
 0x3e6   : > { %v1646_v53 = vld [vmem:[#allocation2 + $0x58] sm:$0xff] (%p1633_p1) }
 0x3e7   : > { %1620 = vst [vmem:[#allocation2 + $0x18] sm:$0xff] %v1604_v5 }
 0x3ec   : > { %v1571_v6 = vpop.f32.mrf.mxu1 }
 0x3ed   : > { %v1605_v7 = vadd.f32 %v1571_v6, %v2823_v40 }
 0x3ee   : > { %v1647_v54 = vld [vmem:[#allocation2 + $0x18] sm:$0xff] (%p1633_p1) }
 0x3ef   : > { %1621 = vst [vmem:[#allocation2 + $0x50] sm:$0xff] %v1605_v7  ;;  %v1661_v58 = vpack.c.bf16 (%p1633_p1), %v1647_v54, %v1646_v53 }
 0x3f4   : > { %v1573_v8 = vpop.f32.mrf.mxu1 }
 0x3f5   : > { %v1606_v34 = vadd.f32 %v1573_v8, %v2825_v41 }
 0x3f6   : > { %v1648_v45 = vld [vmem:[#allocation2 + $0x50] sm:$0xff] (%p1633_p1) }
 0x3f7   : > { %1622 = vst [vmem:[#allocation2 + $0x68] sm:$0xff] %v1606_v34 }
 0x3fc   : > { %v1576_v9 = vpop.f32.mrf.mxu1 }
 0x3fd   : > { %v1607_v35 = vadd.f32 %v1576_v9, %v2829_v43 }
 0x3fe   : > { %v1649_v48 = vld [vmem:[#allocation2 + $0x68] sm:$0xff] (%p1633_p1) }
 0x3ff   : > { %1623 = vst [vmem:[#allocation2 + $0x8] sm:$0xff] %v1607_v35  ;;  %v1662_v52 = vpack.c.bf16 (%p1633_p1), %v1649_v48, %v1648_v45 }
 0x404   : > { %v1578_v10 = vpop.f32.mrf.mxu1 }
 0x405   : > { %v1608_v37 = vadd.f32 %v1578_v10, %v2831_v44 }
 0x406   : > { %v1650_v33 = vld [vmem:[#allocation2 + $0x8] sm:$0xff] (%p1633_p1) }
 0x407   : > { %1624 = vst [vmem:[#allocation2 + $0x48] sm:$0xff] %v1608_v37 }
 0x40c   : > { %v1581_v11 = vpop.f32.mrf.mxu1 }
 0x40d   : > { %v1609_v38 = vadd.f32 %v1581_v11, %v2835_v46 }
 0x40e   : > { %v1651_v36 = vld [vmem:[#allocation2 + $0x48] sm:$0xff] (%p1633_p1) }
 0x40f   : > { %1625 = vst [vmem:[#allocation2 + $0x40] sm:$0xff] %v1609_v38  ;;  %v1663_v42 = vpack.c.bf16 (%p1633_p1), %v1651_v36, %v1650_v33 }
 0x414   : > { %v1583_v12 = vpop.f32.mrf.mxu1 }
 0x415   : > { %v1610_v40 = vadd.f32 %v1583_v12, %v2837_v47 }
 0x416   : > { %v1652_v28 = vld [vmem:[#allocation2 + $0x40] sm:$0xff] (%p1633_p1) }
 0x417   : > { %1626 = vst [vmem:[#allocation2 + $0x20] sm:$0xff] %v1610_v40 }
 0x41e   : > { %v1653_v29 = vld [vmem:[#allocation2 + $0x20] sm:$0xff] (%p1633_p1) }
 0x41f   : > { %v1664_v32 = vpack.c.bf16 (%p1633_p1), %v1653_v29, %v1652_v28 }
 0x422   : > { %v1586_v13 = vpop.f32.mrf.mxu2 }
 0x423   : > { %v1611_v41 = vadd.f32 %v1586_v13, %v2841_v49 }
 0x425   : > { %1627 = vst [vmem:[#allocation2 + $0x10] sm:$0xff] %v1611_v41 }
 0x42a   : > { %v1588_v14 = vpop.f32.mrf.mxu2 }
 0x42b   : > { %v1612_v43 = vadd.f32 %v1588_v14, %v2843_v50 }
 0x42c   : > { %v1654_v25 = vld [vmem:[#allocation2 + $0x10] sm:$0xff] (%p1633_p1) }
 0x42d   : > { %1628 = vst [vmem:[#allocation2 + $0x38] sm:$0xff] %v1612_v43 }
 0x432   : > { %v1591_v15 = vpop.f32.mrf.mxu2 }
 0x433   : > { %v1613_v44 = vadd.f32 %v1591_v15, %v2853_v55 }
 0x434   : > { %v1655_v26 = vld [vmem:[#allocation2 + $0x38] sm:$0xff] (%p1633_p1) }
 0x435   : > { %1629 = vst [vmem:[#allocation2 + $0x60] sm:$0xff] %v1613_v44  ;;  %v1665_v27 = vpack.c.bf16 (%p1633_p1), %v1655_v26, %v1654_v25 }
 0x43a   : > { %v1593_v17 = vpop.f32.mrf.mxu2 }
 0x43b   : > { %v1614_v46 = vadd.f32 %v1593_v17, %v2855_v56  ;;  %v2581_v56 = vmov (%p1633_p1), 0  }
 0x43c   : > { %v1656_v22 = vld [vmem:[#allocation2 + $0x60] sm:$0xff] (%p1633_p1)  ;;  %2391 = vset.pattern.permute.xlu0 (%p1633_p1), %v2581_v56 }
 0x43d   : > { %1630 = vst [vmem:[#allocation2 + $0x70] sm:$0xff] %v1614_v46 }
 0x442   : > { %v1596_v18 = vpop.f32.mrf.mxu2 }
 0x443   : > { %v1615_v47 = vadd.f32 %v1596_v18, %v2871_v62  ;;  %v1681_v62 = vld [vmem:[%s3091_s23] sm:$0xff] (%p1633_p1) }
 0x444   : > { %v1657_v23 = vld [vmem:[#allocation2 + $0x70] sm:$0xff] (%p1633_p1)  ;;  %1684 = vperm.xlu0 (%p1633_p1), %2391, %v1681_v62  }
 0x445   : > { %1631 = vst [vmem:[#allocation2 + $0x78] sm:$0xff] %v1615_v47  ;;  %v1666_v24 = vpack.c.bf16 (%p1633_p1), %v1657_v23, %v1656_v22 }
 0x449   : > { %1637 = sbr.rel (!%p1633_p1) target bundleno = 1406 (0x57e), region = 96 }
 0x44a   : > { %v1598_v19 = vpop.f32.mrf.mxu2 }
 0x44b   : > { %v1616_v49 = vadd.f32 %v1598_v19, %v2873_v63  ;;  %v2243_v63 = vld [vmem:[#allocation10 + $0x38] sm:$0xff] (%p1633_p1) }
 0x44c   : > { %v1658_v50 = vld [vmem:[#allocation2 + $0x78] sm:$0xff] (%p1633_p1)  ;;  %1753 = vmatpush.bf16.msra.mxu1 (%p1633_p1), %v2243_v63 }
 0x44d   : > { %1632 = vst [vmem:[#allocation2 + $0x28] sm:$0xff] %v1616_v49 }
 0x450   : > { %1754 = vmatpush.bf16.msra.mxu1 %v2242_v31 }
 0x454   : > { %v1659_v20 = vld [vmem:[#allocation2 + $0x28] sm:$0xff]  ;;  %1755 = vmatpush.bf16.msra.mxu1 %v2241_v39 }
 0x455   : > { %v1667_v55 = vpack.c.bf16 %v1659_v20, %v1658_v50 }
 0x457   : > { %1668 = vmatpush.bf16.msra.mxu0 %v1667_v55 }
 0x458   : > { %1756 = vmatpush.bf16.msra.mxu1 %v2240_v51 }
 0x45b   : > { %1669 = vmatpush.bf16.msra.mxu0 %v1666_v24 }
 0x45c   : > { %1757 = vmatpush.bf16.msra.mxu1 %v2239_v57 }
 0x45f   : > { %1670 = vmatpush.bf16.msra.mxu0 %v1665_v27 }
 0x460   : > { %1758 = vmatpush.bf16.msra.mxu1 %v2238_v61 }
 0x463   : > { %1671 = vmatpush.bf16.msra.mxu0 %v1664_v32 }
 0x464   : > { %1759 = vmatpush.bf16.msra.mxu1 %v2237_v0 }
 0x467   : > { %1672 = vmatpush.bf16.msra.mxu0 %v1663_v42 }
 0x468   : > { %1760 = vmatpush.bf16.msra.mxu1 %v2236_v2 }
 0x46b   : > { %1673 = vmatpush.bf16.msra.mxu0 %v1662_v52 }
 0x46f   : > { %1674 = vmatpush.bf16.msra.mxu0 %v1661_v58 }
 0x473   : > { %1675 = vmatpush.bf16.msra.mxu0 %v1660_v30 }
 0x476   : > { %2152 = vmatmul.msk.bf16.vlgmr.msra.gmra.mxu0 %vm2151_vm10, %v2582_v1 }
 0x4b6   : > { %v1685_v3 = vpop.permute.xlu0 %1684 }
 0x4f3   : > { %v1677_v4 = vpop.f32.mrf.mxu0 }
 0x4f4   : > { %v1687_v5 = vmul.f32 %v1685_v3, %v1677_v4 }
 0x4f6   : > { %v1688_v6 = vpack.c.bf16 %v1687_v5, %v1687_v5 }
 0x4f8   : > { %1761 = vmatmul.bf16.vlgmr.msra.gmra.mxu1 %v1688_v6 }
 0x4fb   : > { %v1679_v7 = vpop.f32.mrf.mxu0 }
 0x575   : > { %v1762_v8 = vpop.f32.mrf.mxu1 }
 0x576   : > { %1766 = vst [vmem:[#allocation11] sm:$0xff] %v1762_v8 }
 0x57d   : > { %v1764_v34 = vpop.f32.mrf.mxu1 }
 0x57e PF: > { %p2328_p4 = scmp.eq.s32.totalorder %s2678_s27, 2  ;;  %s3093_s28 = sld [smem:[#allocation25_spill]] }
 0x57f   : > { %s2583_s13 = smov [#allocation11]  }
 0x580   : > { %s1773_s16 = sshll.u32 %s2583_s13, 4  ;;  %s1774_s16 = int_to_ptr.vmem [resolvable:$true] %s1773_s16 }
 0x584   : > { %s1775_s15 = sshll.u32 %s3093_s28, 4  ;;  %s1776_s15 = int_to_ptr.hbm [resolvable:$true] %s1775_s15 }
 0x585   : > { %2311 = dma.vmem_to_hbm [thread:$0]  (%p2328_p4), %s1774_s16, 128, %s1776_s15, [#allocation7]  }
 0x586   : > { %2548 = dma.done.wait (%p2328_p4), [#allocation7], 128  }
 0x587   : > { %2550 = vsyncadd (%p2328_p4), [#allocation7], 4294967168 }
 0x588 PF: > { %s29_s26 = sadd.s32 1, %s2573_s26   ;;  %s3094_s29 = sld [smem:[#allocation16_spill]] }
 0x589   : > { %p26_p5 = scmp.ge.s32.totalorder %s29_s26, 5   ;;  %s3095_s23 = sld [smem:[#allocation19_spill]] }
 0x58a   : > { %s3096_s24 = sld [smem:[#allocation17_spill]]  ;;  %s3098_s21 = smov %s2557_s22 }
 0x58b   : > { %s3097_s25 = sld [smem:[#allocation18_spill]]  ;;  %28 = sbr.rel (!%p26_p5) target bundleno = 14 (0xe), region = 150 }
 0x58e   : > { %s3099_s22 = smov %s3094_s29 }
 0x590   :  { %1789 = vsyncpa [#allocation6], 1 }
 0x591   :  { %1791 = vsyncpa [#allocation6 + $0x1], 1 }
 0x592   :  { %1792 = vsyncpa [#allocation9], 1 }
 0x593   :  { %1794 = vsyncpa [#allocation9 + $0x1], 1 }
 0x594   :  { %1795 = vsyncpa [#allocation7], 1 }
 0x595   :  { %1797 = vsyncpa [#allocation7 + $0x1], 1 }

</bundles_post_ra>
